<compile_context>
chip_gen: v5e
topology: v5e:2x2
jax: 0.10.0
libtpu: 0.0.40
codegen_flags: <defaults>
</compile_context>

<pallas_src>
import jax
import jax.numpy as jnp
from jax.experimental import pallas as pl
from jax.experimental.pallas import tpu as pltpu

# --- synthetic config (small, consistent with the forward pass) ---
B = 2            # batch
S = 16           # sequence length
H = 32           # hidden size
NUM_HEADS = 4
HEAD_DIM = H // NUM_HEADS
FFN = 64
NUM_LAYERS = 2
VOCAB = 128
MAX_POS = 32
NUM_LABELS = 7   # len(labels_ids) in integrated_model
LPAD = 128       # lane-dense padded logits width (sliced back to NUM_LABELS in glue)
LN_EPS = 1e-5
BF = jnp.bfloat16
F32 = jnp.float32


def _layer_norm(x, g, b):
    mu = jnp.mean(x, axis=-1, keepdims=True)
    var = jnp.mean((x - mu) ** 2, axis=-1, keepdims=True)
    return (x - mu) * jax.lax.rsqrt(var + LN_EPS) * g + b


def fused_forward_kernel(posc_ref, posr_ref, attn_ref, emb_ref, pe_ref,
                         te_ref, eg_ref, eb_ref,
                         wqkv_ref, bqkv_ref, wo_ref, bo_ref,
                         ln1g_ref, ln1b_ref, w1_ref, b1_ref,
                         w2_ref, b2_ref, ln2g_ref, ln2b_ref,
                         cw_ref, cb_ref,
                         out_ref):
    # One grid step == one batch element (sharded across TensorCores on v7x).
    # ------------------------------------------------------------------
    # 1) GraphCodeBERT node->token masked-average embedding mixing
    # ------------------------------------------------------------------
    nodes_c = (posc_ref[0] == 0).astype(F32)           # (S, 1)
    toks_r = (posr_ref[0] >= 2).astype(F32)            # (1, S)
    attn01 = (attn_ref[0] > 0.0).astype(F32)           # (S, S) 0/1 mask

    m = nodes_c * toks_r * attn01                       # (S, S)
    m = m / (jnp.sum(m, axis=-1, keepdims=True) + 1e-10)
    emb = emb_ref[0]                                     # (S, H) f32
    avg = jnp.dot(m.astype(BF), emb.astype(BF), preferred_element_type=F32)
    mixed = emb * (1.0 - nodes_c) + avg * nodes_c        # (S, H)

    # ------------------------------------------------------------------
    # 2) RoBERTa embeddings (word + pos + type row 0) + LayerNorm
    # ------------------------------------------------------------------
    x = mixed + pe_ref[0] + te_ref[...]
    x = _layer_norm(x, eg_ref[...], eb_ref[...])         # (S, H) f32

    # additive attention bias, built once and broadcast over heads
    bias = (1.0 - attn01) * (-1e9)                       # (S, S)

    # ------------------------------------------------------------------
    # 3) Transformer encoder layers (post-LN); weights VMEM-resident,
    #    bf16 matmul operands + f32 accumulation, elementwise math in f32.
    #    Softmax scale is pre-folded into the Q columns of wqkv at init.
    # ------------------------------------------------------------------
    for l in range(NUM_LAYERS):
        # fused QKV projection: one (S,H) x (H,3H) matmul
        qkv = jnp.dot(x.astype(BF), wqkv_ref[l],
                      preferred_element_type=F32) + bqkv_ref[l]      # (S, 3H)
        qkvb = qkv.astype(BF)

        def heads(base):
            # head-major stack: (NUM_HEADS, S, HEAD_DIM), leading batch dim
            return jnp.stack(
                [qkvb[:, base + h * HEAD_DIM: base + (h + 1) * HEAD_DIM]
                 for h in range(NUM_HEADS)], axis=0)

        q = heads(0 * H)
        k = heads(1 * H)
        v = heads(2 * H)

        # batched attention over all heads in one einsum each (flash-style layout)
        s = jnp.einsum('hqd,hkd->hqk', q, k,
                       preferred_element_type=F32) + bias            # (NH, S, S)
        s = s - jnp.max(s, axis=-1, keepdims=True)
        p = jnp.exp(s)
        # NOTE: approx reciprocal is a perf knob (~1e-3 rel err vs exact divide).
        p = p * pl.reciprocal(jnp.sum(p, axis=-1, keepdims=True), approx=True)
        ctx_h = jnp.einsum('hqk,hkd->hqd', p.astype(BF), v,
                           preferred_element_type=F32)               # (NH, S, HD)
        # merge heads back to lane-dense (S, H) in vregs (no scratch round-trip)
        ctx = jnp.concatenate([ctx_h[h] for h in range(NUM_HEADS)], axis=-1)

        attn_out = jnp.dot(ctx.astype(BF), wo_ref[l],
                           preferred_element_type=F32) + bo_ref[l]
        h1 = _layer_norm(x + attn_out, ln1g_ref[l], ln1b_ref[l])

        f = jnp.dot(h1.astype(BF), w1_ref[l],
                    preferred_element_type=F32) + b1_ref[l]
        # TODO(synk): HF RoBERTa uses exact erf GELU; tanh approximation kept here
        # for guaranteed Mosaic/EUP lowering (numeric delta ~1e-3).
        f = jax.nn.gelu(f, approximate=True)
        f = jnp.dot(f.astype(BF), w2_ref[l],
                    preferred_element_type=F32) + b2_ref[l]
        x = _layer_norm(h1 + f, ln2g_ref[l], ln2b_ref[l])

    # ------------------------------------------------------------------
    # 4) RobertaClassificationHead (per the spec):
    #    features[:, 0, :] -> dense(H -> num_labels) -> tanh  (dropout = identity)
    #    CLS row is a free static slice; logits go to a lane-dense (1, 128) slab.
    # ------------------------------------------------------------------
    cls_vec = x[0:1, :]                                              # (1, H)
    logits = jnp.dot(cls_vec.astype(BF), cw_ref[...],
                     preferred_element_type=F32) + cb_ref[...]       # (1, LPAD)
    out_ref[0] = jnp.tanh(logits)


# ---------------------------------------------------------------------------
# Parameter init (deterministic, synthetic). Matmul weights stored in bf16,
# biases / LN params in f32. Per-layer weights stacked along a leading L axis.
# The 1/sqrt(HEAD_DIM) softmax scale is folded into the Q projection columns.
# ---------------------------------------------------------------------------
def init_params(key):
    ks = jax.random.split(key, 8)

    def nrm(k, shape, scale=0.02):
        return jax.random.normal(k, shape, F32) * scale

    scale_q = 1.0 / (HEAD_DIM ** 0.5)

    params = {
        'word_emb': nrm(ks[0], (VOCAB, H)),
        'pos_emb': nrm(ks[1], (MAX_POS, H)),
        'type_emb': nrm(ks[2], (1, H)),
        'emb_ln_g': jnp.ones((1, H), F32),
        'emb_ln_b': jnp.zeros((1, H), F32),
        # lane-dense padded classifier weights: columns >= NUM_LABELS are zero
        'cls_w': jnp.zeros((H, LPAD), F32).at[:, :NUM_LABELS].set(
            nrm(ks[3], (H, NUM_LABELS))).astype(BF),
        'cls_b': jnp.zeros((1, LPAD), F32),
    }

    lk = jax.random.split(ks[4], 4 * NUM_LAYERS)
    wqkv, wo, w1, w2 = [], [], [], []
    for l in range(NUM_LAYERS):
        w = nrm(lk[4 * l + 0], (H, 3 * H))
        w = w.at[:, :H].multiply(scale_q)   # fold softmax scale into Q columns
        wqkv.append(w.astype(BF))
        wo.append(nrm(lk[4 * l + 1], (H, H)).astype(BF))
        w1.append(nrm(lk[4 * l + 2], (H, FFN)).astype(BF))
        w2.append(nrm(lk[4 * l + 3], (FFN, H)).astype(BF))
    params.update(
        # NOTE: the Q slice of bqkv would also need the scale fold; it is zero here.
        wqkv=jnp.stack(wqkv), bqkv=jnp.zeros((NUM_LAYERS, 1, 3 * H), F32),
        wo=jnp.stack(wo), bo=jnp.zeros((NUM_LAYERS, 1, H), F32),
        ln1_g=jnp.ones((NUM_LAYERS, 1, H), F32),
        ln1_b=jnp.zeros((NUM_LAYERS, 1, H), F32),
        w1=jnp.stack(w1), b1=jnp.zeros((NUM_LAYERS, 1, FFN), F32),
        w2=jnp.stack(w2), b2=jnp.zeros((NUM_LAYERS, 1, H), F32),
        ln2_g=jnp.ones((NUM_LAYERS, 1, H), F32),
        ln2_b=jnp.zeros((NUM_LAYERS, 1, H), F32),
    )
    return params


def _batch_spec(full_shape):
    """Block = one batch element, all trailing dims full (trailing dims == array dims)."""
    nd = len(full_shape)
    return pl.BlockSpec((1,) + tuple(full_shape[1:]),
                        lambda b, _nd=nd: (b,) + (0,) * (_nd - 1))


def _rep_spec(full_shape):
    """Whole array every grid step (same block index -> no re-DMA)."""
    nd = len(full_shape)
    return pl.BlockSpec(tuple(full_shape), lambda b, _nd=nd: (0,) * _nd)


# ---------------------------------------------------------------------------
# Full forward: integrated_model(x) for model_name == 'GraphCodeBERT'
# (embedding-table gathers stay in JAX glue; everything else is one fused kernel)
# ---------------------------------------------------------------------------
@jax.jit
def integrated_model_forward(params, inputs_ids, position_idx, attn_mask):
    inputs_emb = jnp.take(params['word_emb'], inputs_ids, axis=0)       # (B,S,H)
    # position_ids = position_idx
    pos_e = jnp.take(params['pos_emb'], position_idx, axis=0)           # (B,S,H)
    # TODO(synk): token_type_ids = position_idx.eq(-1) in the original; padded (-1)
    # positions would select type row 1 -- this path always adds type row 0.

    pos_col = position_idx.reshape(B, S, 1).astype(jnp.int32)
    pos_row = position_idx.reshape(B, 1, S).astype(jnp.int32)
    attn_f = attn_mask.astype(F32)

    operands = (pos_col, pos_row, attn_f, inputs_emb, pos_e,
                params['type_emb'], params['emb_ln_g'], params['emb_ln_b'],
                params['wqkv'], params['bqkv'], params['wo'], params['bo'],
                params['ln1_g'], params['ln1_b'], params['w1'], params['b1'],
                params['w2'], params['b2'], params['ln2_g'], params['ln2_b'],
                params['cls_w'], params['cls_b'])

    # first 5 operands are per-batch; the rest are weights replicated over the grid
    in_specs = [_batch_spec(x.shape) if i < 5 else _rep_spec(x.shape)
                for i, x in enumerate(operands)]

    logits_pad = pl.pallas_call(
        fused_forward_kernel,
        out_shape=jax.ShapeDtypeStruct((B, 1, LPAD), F32),
        grid=(B,),
        in_specs=in_specs,
        out_specs=pl.BlockSpec((1, 1, LPAD), lambda b: (b, 0, 0)),
        compiler_params=pltpu.CompilerParams(
            dimension_semantics=("parallel",)),
    )(*operands)

    return logits_pad[:, 0, :NUM_LABELS]


if __name__ == "__main__":
    key = jax.random.PRNGKey(0)
    k_param, k_ids = jax.random.split(key)

    params = init_params(k_param)

    # deterministic example inputs (x = (inputs_ids, position_idx, attn_mask, labels))
    inputs_ids = jax.random.randint(k_ids, (B, S), 0, VOCAB, dtype=jnp.int32)
    # first 4 positions are DFG "nodes" (pos == 0), the rest are code tokens (pos >= 2)
    position_idx = jnp.concatenate(
        [jnp.zeros((B, 4), jnp.int32),
         jnp.broadcast_to(jnp.arange(2, 2 + S - 4, dtype=jnp.int32), (B, S - 4))],
        axis=1)
    attn_mask = jnp.ones((B, S, S), jnp.float32)
    labels = jnp.zeros((B,), jnp.int32)   # part of x; unused by the logits path

    logits = integrated_model_forward(params, inputs_ids, position_idx, attn_mask)
    logits = jax.block_until_ready(logits)
    assert logits.shape == (B, NUM_LABELS)
    print("KERNEL_OK")
</pallas_src>

<mosaic_0001>
module attributes {stable_mosaic.version = 11 : i64} {
  func.func @fused_forward_kernel(%arg0: i32, %arg1: memref<1x16x1xi32, #tpu.memory_space<vmem>>, %arg2: memref<1x1x16xi32, #tpu.memory_space<vmem>>, %arg3: memref<1x16x16xf32, #tpu.memory_space<vmem>>, %arg4: memref<1x16x32xf32, #tpu.memory_space<vmem>>, %arg5: memref<1x16x32xf32, #tpu.memory_space<vmem>>, %arg6: memref<1x32xf32, #tpu.memory_space<vmem>>, %arg7: memref<1x32xf32, #tpu.memory_space<vmem>>, %arg8: memref<1x32xf32, #tpu.memory_space<vmem>>, %arg9: memref<2x32x96xbf16, #tpu.memory_space<vmem>>, %arg10: memref<2x1x96xf32, #tpu.memory_space<vmem>>, %arg11: memref<2x32x32xbf16, #tpu.memory_space<vmem>>, %arg12: memref<2x1x32xf32, #tpu.memory_space<vmem>>, %arg13: memref<2x1x32xf32, #tpu.memory_space<vmem>>, %arg14: memref<2x1x32xf32, #tpu.memory_space<vmem>>, %arg15: memref<2x32x64xbf16, #tpu.memory_space<vmem>>, %arg16: memref<2x1x64xf32, #tpu.memory_space<vmem>>, %arg17: memref<2x64x32xbf16, #tpu.memory_space<vmem>>, %arg18: memref<2x1x32xf32, #tpu.memory_space<vmem>>, %arg19: memref<2x1x32xf32, #tpu.memory_space<vmem>>, %arg20: memref<2x1x32xf32, #tpu.memory_space<vmem>>, %arg21: memref<32x128xbf16, #tpu.memory_space<vmem>>, %arg22: memref<1x128xf32, #tpu.memory_space<vmem>>, %arg23: memref<1x1x128xf32, #tpu.memory_space<vmem>>) attributes {dimension_semantics = [#tpu.dimension_semantics<parallel>], iteration_bounds = array<i64: 2>, scalar_prefetch = 0 : i64, scratch_operands = 0 : i64, tpu.core_type = #tpu.core_type<tc>, window_params = [{transform_indices = @transform_0, window_bounds = array<i64: 1, 16, 1>}, {transform_indices = @transform_1, window_bounds = array<i64: 1, 1, 16>}, {transform_indices = @transform_2, window_bounds = array<i64: 1, 16, 16>}, {transform_indices = @transform_3, window_bounds = array<i64: 1, 16, 32>}, {transform_indices = @transform_4, window_bounds = array<i64: 1, 16, 32>}, {pipeline_mode = #tpu.pipeline_mode<synchronous>, transform_indices = @transform_5, window_bounds = array<i64: 1, 32>}, {pipeline_mode = #tpu.pipeline_mode<synchronous>, transform_indices = @transform_6, window_bounds = array<i64: 1, 32>}, {pipeline_mode = #tpu.pipeline_mode<synchronous>, transform_indices = @transform_7, window_bounds = array<i64: 1, 32>}, {pipeline_mode = #tpu.pipeline_mode<synchronous>, transform_indices = @transform_8, window_bounds = array<i64: 2, 32, 96>}, {pipeline_mode = #tpu.pipeline_mode<synchronous>, transform_indices = @transform_9, window_bounds = array<i64: 2, 1, 96>}, {pipeline_mode = #tpu.pipeline_mode<synchronous>, transform_indices = @transform_10, window_bounds = array<i64: 2, 32, 32>}, {pipeline_mode = #tpu.pipeline_mode<synchronous>, transform_indices = @transform_11, window_bounds = array<i64: 2, 1, 32>}, {pipeline_mode = #tpu.pipeline_mode<synchronous>, transform_indices = @transform_12, window_bounds = array<i64: 2, 1, 32>}, {pipeline_mode = #tpu.pipeline_mode<synchronous>, transform_indices = @transform_13, window_bounds = array<i64: 2, 1, 32>}, {pipeline_mode = #tpu.pipeline_mode<synchronous>, transform_indices = @transform_14, window_bounds = array<i64: 2, 32, 64>}, {pipeline_mode = #tpu.pipeline_mode<synchronous>, transform_indices = @transform_15, window_bounds = array<i64: 2, 1, 64>}, {pipeline_mode = #tpu.pipeline_mode<synchronous>, transform_indices = @transform_16, window_bounds = array<i64: 2, 64, 32>}, {pipeline_mode = #tpu.pipeline_mode<synchronous>, transform_indices = @transform_17, window_bounds = array<i64: 2, 1, 32>}, {pipeline_mode = #tpu.pipeline_mode<synchronous>, transform_indices = @transform_18, window_bounds = array<i64: 2, 1, 32>}, {pipeline_mode = #tpu.pipeline_mode<synchronous>, transform_indices = @transform_19, window_bounds = array<i64: 2, 1, 32>}, {pipeline_mode = #tpu.pipeline_mode<synchronous>, transform_indices = @transform_20, window_bounds = array<i64: 32, 128>}, {pipeline_mode = #tpu.pipeline_mode<synchronous>, transform_indices = @transform_21, window_bounds = array<i64: 1, 128>}, {transform_indices = @transform_22, window_bounds = array<i64: 1, 1, 128>}]} {
    %c0 = arith.constant 0 : index
    %c0_0 = arith.constant 0 : index
    %c0_1 = arith.constant 0 : index
    %0 = vector.load %arg1[%c0, %c0_0, %c0_1] : memref<1x16x1xi32, #tpu.memory_space<vmem>>, vector<1x16x1xi32>
    %1 = vector.shape_cast %0 : vector<1x16x1xi32> to vector<16x1xi32>
    %c0_i32 = arith.constant 0 : i32
    %2 = vector.broadcast %c0_i32 : i32 to vector<16x1xi32>
    %3 = arith.cmpi eq, %1, %2 : vector<16x1xi32>
    %4 = arith.extui %3 : vector<16x1xi1> to vector<16x1xi32>
    %5 = arith.sitofp %4 : vector<16x1xi32> to vector<16x1xf32>
    %c0_2 = arith.constant 0 : index
    %c0_3 = arith.constant 0 : index
    %c0_4 = arith.constant 0 : index
    %6 = vector.load %arg2[%c0_2, %c0_3, %c0_4] : memref<1x1x16xi32, #tpu.memory_space<vmem>>, vector<1x1x16xi32>
    %7 = vector.shape_cast %6 : vector<1x1x16xi32> to vector<1x16xi32>
    %c2_i32 = arith.constant 2 : i32
    %8 = vector.broadcast %c2_i32 : i32 to vector<1x16xi32>
    %9 = arith.cmpi sge, %7, %8 : vector<1x16xi32>
    %10 = arith.extui %9 : vector<1x16xi1> to vector<1x16xi32>
    %11 = arith.sitofp %10 : vector<1x16xi32> to vector<1x16xf32>
    %c0_5 = arith.constant 0 : index
    %c0_6 = arith.constant 0 : index
    %c0_7 = arith.constant 0 : index
    %12 = vector.load %arg3[%c0_5, %c0_6, %c0_7] : memref<1x16x16xf32, #tpu.memory_space<vmem>>, vector<1x16x16xf32>
    %13 = vector.shape_cast %12 : vector<1x16x16xf32> to vector<16x16xf32>
    %cst = arith.constant 0.000000e+00 : f32
    %14 = vector.broadcast %cst : f32 to vector<16x16xf32>
    %15 = arith.cmpf ogt, %13, %14 : vector<16x16xf32>
    %16 = arith.extui %15 : vector<16x16xi1> to vector<16x16xi32>
    %17 = arith.sitofp %16 : vector<16x16xi32> to vector<16x16xf32>
    %18 = vector.broadcast %5 : vector<16x1xf32> to vector<16x16xf32>
    %19 = vector.broadcast %11 : vector<1x16xf32> to vector<16x16xf32>
    %20 = arith.mulf %18, %19 : vector<16x16xf32>
    %21 = arith.mulf %20, %17 : vector<16x16xf32>
    %cst_8 = arith.constant dense<0.000000e+00> : vector<16xf32>
    %22 = vector.multi_reduction <add>, %21, %cst_8 [1] : vector<16x16xf32> to vector<16xf32>
    %23 = vector.shape_cast %22 : vector<16xf32> to vector<16x1xf32>
    %cst_9 = arith.constant 1.000000e-10 : f32
    %24 = vector.broadcast %cst_9 : f32 to vector<16x1xf32>
    %25 = arith.addf %23, %24 : vector<16x1xf32>
    %26 = vector.broadcast %25 : vector<16x1xf32> to vector<16x16xf32>
    %27 = arith.divf %21, %26 : vector<16x16xf32>
    %c0_10 = arith.constant 0 : index
    %c0_11 = arith.constant 0 : index
    %c0_12 = arith.constant 0 : index
    %28 = vector.load %arg4[%c0_10, %c0_11, %c0_12] : memref<1x16x32xf32, #tpu.memory_space<vmem>>, vector<1x16x32xf32>
    %29 = vector.shape_cast %28 : vector<1x16x32xf32> to vector<16x32xf32>
    %30 = arith.truncf %27 : vector<16x16xf32> to vector<16x16xbf16>
    %31 = arith.truncf %29 : vector<16x32xf32> to vector<16x32xbf16>
    %cst_13 = arith.constant dense<0.000000e+00> : vector<16x32xf32>
    %32 = tpu.matmul %30, %31, %cst_13 {dimension_numbers = #tpu.dot_dimension_numbers<[1], [0], [0], [1], [0, 0, 1, 1], [], []>} : vector<16x16xbf16>, vector<16x32xbf16>, vector<16x32xf32> -> vector<16x32xf32>
    %cst_14 = arith.constant 1.000000e+00 : f32
    %33 = vector.broadcast %cst_14 : f32 to vector<16x1xf32>
    %34 = arith.subf %33, %5 : vector<16x1xf32>
    %35 = vector.broadcast %34 : vector<16x1xf32> to vector<16x32xf32>
    %36 = arith.mulf %29, %35 : vector<16x32xf32>
    %37 = vector.broadcast %5 : vector<16x1xf32> to vector<16x32xf32>
    %38 = arith.mulf %32, %37 : vector<16x32xf32>
    %39 = arith.addf %36, %38 : vector<16x32xf32>
    %c0_15 = arith.constant 0 : index
    %c0_16 = arith.constant 0 : index
    %c0_17 = arith.constant 0 : index
    %40 = vector.load %arg5[%c0_15, %c0_16, %c0_17] : memref<1x16x32xf32, #tpu.memory_space<vmem>>, vector<1x16x32xf32>
    %41 = vector.shape_cast %40 : vector<1x16x32xf32> to vector<16x32xf32>
    %42 = arith.addf %39, %41 : vector<16x32xf32>
    %c0_18 = arith.constant 0 : index
    %c0_19 = arith.constant 0 : index
    %43 = vector.load %arg6[%c0_18, %c0_19] : memref<1x32xf32, #tpu.memory_space<vmem>>, vector<1x32xf32>
    %44 = vector.broadcast %43 : vector<1x32xf32> to vector<16x32xf32>
    %45 = arith.addf %42, %44 : vector<16x32xf32>
    %c0_20 = arith.constant 0 : index
    %c0_21 = arith.constant 0 : index
    %46 = vector.load %arg7[%c0_20, %c0_21] : memref<1x32xf32, #tpu.memory_space<vmem>>, vector<1x32xf32>
    %c0_22 = arith.constant 0 : index
    %c0_23 = arith.constant 0 : index
    %47 = vector.load %arg8[%c0_22, %c0_23] : memref<1x32xf32, #tpu.memory_space<vmem>>, vector<1x32xf32>
    %cst_24 = arith.constant dense<0.000000e+00> : vector<16xf32>
    %48 = vector.multi_reduction <add>, %45, %cst_24 [1] : vector<16x32xf32> to vector<16xf32>
    %49 = vector.shape_cast %48 : vector<16xf32> to vector<16x1xf32>
    %cst_25 = arith.constant 3.200000e+01 : f32
    %50 = vector.broadcast %cst_25 : f32 to vector<16x1xf32>
    %51 = arith.divf %49, %50 : vector<16x1xf32>
    %52 = vector.broadcast %51 : vector<16x1xf32> to vector<16x32xf32>
    %53 = arith.subf %45, %52 : vector<16x32xf32>
    %54 = arith.mulf %53, %53 : vector<16x32xf32>
    %cst_26 = arith.constant dense<0.000000e+00> : vector<16xf32>
    %55 = vector.multi_reduction <add>, %54, %cst_26 [1] : vector<16x32xf32> to vector<16xf32>
    %56 = vector.shape_cast %55 : vector<16xf32> to vector<16x1xf32>
    %cst_27 = arith.constant 3.200000e+01 : f32
    %57 = vector.broadcast %cst_27 : f32 to vector<16x1xf32>
    %58 = arith.divf %56, %57 : vector<16x1xf32>
    %59 = vector.broadcast %51 : vector<16x1xf32> to vector<16x32xf32>
    %60 = arith.subf %45, %59 : vector<16x32xf32>
    %cst_28 = arith.constant 9.99999974E-6 : f32
    %61 = vector.broadcast %cst_28 : f32 to vector<16x1xf32>
    %62 = arith.addf %58, %61 : vector<16x1xf32>
    %63 = math.rsqrt %62 : vector<16x1xf32>
    %64 = vector.broadcast %63 : vector<16x1xf32> to vector<16x32xf32>
    %65 = arith.mulf %60, %64 : vector<16x32xf32>
    %66 = vector.broadcast %46 : vector<1x32xf32> to vector<16x32xf32>
    %67 = arith.mulf %65, %66 : vector<16x32xf32>
    %68 = vector.broadcast %47 : vector<1x32xf32> to vector<16x32xf32>
    %69 = arith.addf %67, %68 : vector<16x32xf32>
    %cst_29 = arith.constant 1.000000e+00 : f32
    %70 = vector.broadcast %cst_29 : f32 to vector<16x16xf32>
    %71 = arith.subf %70, %17 : vector<16x16xf32>
    %cst_30 = arith.constant -1.000000e+09 : f32
    %72 = vector.broadcast %cst_30 : f32 to vector<16x16xf32>
    %73 = arith.mulf %71, %72 : vector<16x16xf32>
    %74 = arith.truncf %69 : vector<16x32xf32> to vector<16x32xbf16>
    %c0_31 = arith.constant 0 : index
    %c0_32 = arith.constant 0 : index
    %c0_33 = arith.constant 0 : index
    %75 = vector.load %arg9[%c0_31, %c0_32, %c0_33] : memref<2x32x96xbf16, #tpu.memory_space<vmem>>, vector<1x32x96xbf16>
    %76 = vector.shape_cast %75 : vector<1x32x96xbf16> to vector<32x96xbf16>
    %cst_34 = arith.constant dense<0.000000e+00> : vector<16x96xf32>
    %77 = tpu.matmul %74, %76, %cst_34 {dimension_numbers = #tpu.dot_dimension_numbers<[1], [0], [0], [1], [0, 0, 1, 1], [], []>} : vector<16x32xbf16>, vector<32x96xbf16>, vector<16x96xf32> -> vector<16x96xf32>
    %c0_35 = arith.constant 0 : index
    %c0_36 = arith.constant 0 : index
    %c0_37 = arith.constant 0 : index
    %78 = vector.load %arg10[%c0_35, %c0_36, %c0_37] : memref<2x1x96xf32, #tpu.memory_space<vmem>>, vector<1x1x96xf32>
    %79 = vector.shape_cast %78 : vector<1x1x96xf32> to vector<1x96xf32>
    %80 = vector.broadcast %79 : vector<1x96xf32> to vector<16x96xf32>
    %81 = arith.addf %77, %80 : vector<16x96xf32>
    %82 = arith.truncf %81 : vector<16x96xf32> to vector<16x96xbf16>
    %83 = vector.extract_strided_slice %82 {offsets = [0, 0], sizes = [16, 8], strides = [1, 1]} : vector<16x96xbf16> to vector<16x8xbf16>
    %84 = vector.extract_strided_slice %82 {offsets = [0, 8], sizes = [16, 8], strides = [1, 1]} : vector<16x96xbf16> to vector<16x8xbf16>
    %85 = vector.extract_strided_slice %82 {offsets = [0, 16], sizes = [16, 8], strides = [1, 1]} : vector<16x96xbf16> to vector<16x8xbf16>
    %86 = vector.extract_strided_slice %82 {offsets = [0, 24], sizes = [16, 8], strides = [1, 1]} : vector<16x96xbf16> to vector<16x8xbf16>
    %87 = vector.shape_cast %83 : vector<16x8xbf16> to vector<1x16x8xbf16>
    %88 = vector.shape_cast %84 : vector<16x8xbf16> to vector<1x16x8xbf16>
    %89 = vector.shape_cast %85 : vector<16x8xbf16> to vector<1x16x8xbf16>
    %90 = vector.shape_cast %86 : vector<16x8xbf16> to vector<1x16x8xbf16>
    %91 = tpu.concatenate %87, %88, %89, %90 in 0 : vector<1x16x8xbf16>, vector<1x16x8xbf16>, vector<1x16x8xbf16>, vector<1x16x8xbf16> -> vector<4x16x8xbf16>
    %92 = vector.extract_strided_slice %82 {offsets = [0, 32], sizes = [16, 8], strides = [1, 1]} : vector<16x96xbf16> to vector<16x8xbf16>
    %93 = vector.extract_strided_slice %82 {offsets = [0, 40], sizes = [16, 8], strides = [1, 1]} : vector<16x96xbf16> to vector<16x8xbf16>
    %94 = vector.extract_strided_slice %82 {offsets = [0, 48], sizes = [16, 8], strides = [1, 1]} : vector<16x96xbf16> to vector<16x8xbf16>
    %95 = vector.extract_strided_slice %82 {offsets = [0, 56], sizes = [16, 8], strides = [1, 1]} : vector<16x96xbf16> to vector<16x8xbf16>
    %96 = vector.shape_cast %92 : vector<16x8xbf16> to vector<1x16x8xbf16>
    %97 = vector.shape_cast %93 : vector<16x8xbf16> to vector<1x16x8xbf16>
    %98 = vector.shape_cast %94 : vector<16x8xbf16> to vector<1x16x8xbf16>
    %99 = vector.shape_cast %95 : vector<16x8xbf16> to vector<1x16x8xbf16>
    %100 = tpu.concatenate %96, %97, %98, %99 in 0 : vector<1x16x8xbf16>, vector<1x16x8xbf16>, vector<1x16x8xbf16>, vector<1x16x8xbf16> -> vector<4x16x8xbf16>
    %101 = vector.extract_strided_slice %82 {offsets = [0, 64], sizes = [16, 8], strides = [1, 1]} : vector<16x96xbf16> to vector<16x8xbf16>
    %102 = vector.extract_strided_slice %82 {offsets = [0, 72], sizes = [16, 8], strides = [1, 1]} : vector<16x96xbf16> to vector<16x8xbf16>
    %103 = vector.extract_strided_slice %82 {offsets = [0, 80], sizes = [16, 8], strides = [1, 1]} : vector<16x96xbf16> to vector<16x8xbf16>
    %104 = vector.extract_strided_slice %82 {offsets = [0, 88], sizes = [16, 8], strides = [1, 1]} : vector<16x96xbf16> to vector<16x8xbf16>
    %105 = vector.shape_cast %101 : vector<16x8xbf16> to vector<1x16x8xbf16>
    %106 = vector.shape_cast %102 : vector<16x8xbf16> to vector<1x16x8xbf16>
    %107 = vector.shape_cast %103 : vector<16x8xbf16> to vector<1x16x8xbf16>
    %108 = vector.shape_cast %104 : vector<16x8xbf16> to vector<1x16x8xbf16>
    %109 = tpu.concatenate %105, %106, %107, %108 in 0 : vector<1x16x8xbf16>, vector<1x16x8xbf16>, vector<1x16x8xbf16>, vector<1x16x8xbf16> -> vector<4x16x8xbf16>
    "tpu.trace_start"() <{level = 10 : i32, message = "hqd,hkd->hqk"}> : () -> ()
    %cst_38 = arith.constant dense<0.000000e+00> : vector<4x16x16xf32>
    %110 = tpu.matmul %91, %100, %cst_38 {dimension_numbers = #tpu.dot_dimension_numbers<[2], [2], [1], [1], [0, 0, 0, 1, 1, 1], [0], [0]>} : vector<4x16x8xbf16>, vector<4x16x8xbf16>, vector<4x16x16xf32> -> vector<4x16x16xf32>
    "tpu.trace_stop"() : () -> ()
    %111 = vector.shape_cast %73 : vector<16x16xf32> to vector<1x16x16xf32>
    %112 = vector.broadcast %111 : vector<1x16x16xf32> to vector<4x16x16xf32>
    %113 = arith.addf %110, %112 : vector<4x16x16xf32>
    %cst_39 = arith.constant dense<0xFF800000> : vector<4x16xf32>
    %114 = vector.multi_reduction <maximumf>, %113, %cst_39 [2] : vector<4x16x16xf32> to vector<4x16xf32>
    %115 = vector.shape_cast %114 : vector<4x16xf32> to vector<4x16x1xf32>
    %116 = vector.broadcast %115 : vector<4x16x1xf32> to vector<4x16x16xf32>
    %117 = arith.subf %113, %116 : vector<4x16x16xf32>
    %118 = math.exp %117 : vector<4x16x16xf32>
    %cst_40 = arith.constant dense<0.000000e+00> : vector<4x16xf32>
    %119 = vector.multi_reduction <add>, %118, %cst_40 [2] : vector<4x16x16xf32> to vector<4x16xf32>
    %120 = vector.shape_cast %119 : vector<4x16xf32> to vector<4x16x1xf32>
    %121 = tpu.reciprocal %120 {approx = true} : vector<4x16x1xf32> -> vector<4x16x1xf32>
    %122 = vector.broadcast %121 : vector<4x16x1xf32> to vector<4x16x16xf32>
    %123 = arith.mulf %118, %122 : vector<4x16x16xf32>
    %124 = arith.truncf %123 : vector<4x16x16xf32> to vector<4x16x16xbf16>
    "tpu.trace_start"() <{level = 10 : i32, message = "hqk,hkd->hqd"}> : () -> ()
    %cst_41 = arith.constant dense<0.000000e+00> : vector<4x16x8xf32>
    %125 = tpu.matmul %124, %109, %cst_41 {dimension_numbers = #tpu.dot_dimension_numbers<[2], [1], [1], [2], [0, 0, 0, 1, 1, 2], [0], [0]>} : vector<4x16x16xbf16>, vector<4x16x8xbf16>, vector<4x16x8xf32> -> vector<4x16x8xf32>
    "tpu.trace_stop"() : () -> ()
    %126 = vector.extract_strided_slice %125 {offsets = [0, 0, 0], sizes = [1, 16, 8], strides = [1, 1, 1]} : vector<4x16x8xf32> to vector<1x16x8xf32>
    %127 = vector.shape_cast %126 : vector<1x16x8xf32> to vector<16x8xf32>
    %128 = vector.extract_strided_slice %125 {offsets = [1, 0, 0], sizes = [1, 16, 8], strides = [1, 1, 1]} : vector<4x16x8xf32> to vector<1x16x8xf32>
    %129 = vector.shape_cast %128 : vector<1x16x8xf32> to vector<16x8xf32>
    %130 = vector.extract_strided_slice %125 {offsets = [2, 0, 0], sizes = [1, 16, 8], strides = [1, 1, 1]} : vector<4x16x8xf32> to vector<1x16x8xf32>
    %131 = vector.shape_cast %130 : vector<1x16x8xf32> to vector<16x8xf32>
    %132 = vector.extract_strided_slice %125 {offsets = [3, 0, 0], sizes = [1, 16, 8], strides = [1, 1, 1]} : vector<4x16x8xf32> to vector<1x16x8xf32>
    %133 = vector.shape_cast %132 : vector<1x16x8xf32> to vector<16x8xf32>
    %134 = tpu.concatenate %127, %129, %131, %133 in 1 : vector<16x8xf32>, vector<16x8xf32>, vector<16x8xf32>, vector<16x8xf32> -> vector<16x32xf32>
    %135 = arith.truncf %134 : vector<16x32xf32> to vector<16x32xbf16>
    %c0_42 = arith.constant 0 : index
    %c0_43 = arith.constant 0 : index
    %c0_44 = arith.constant 0 : index
    %136 = vector.load %arg11[%c0_42, %c0_43, %c0_44] : memref<2x32x32xbf16, #tpu.memory_space<vmem>>, vector<1x32x32xbf16>
    %137 = vector.shape_cast %136 : vector<1x32x32xbf16> to vector<32x32xbf16>
    %cst_45 = arith.constant dense<0.000000e+00> : vector<16x32xf32>
    %138 = tpu.matmul %135, %137, %cst_45 {dimension_numbers = #tpu.dot_dimension_numbers<[1], [0], [0], [1], [0, 0, 1, 1], [], []>} : vector<16x32xbf16>, vector<32x32xbf16>, vector<16x32xf32> -> vector<16x32xf32>
    %c0_46 = arith.constant 0 : index
    %c0_47 = arith.constant 0 : index
    %c0_48 = arith.constant 0 : index
    %139 = vector.load %arg12[%c0_46, %c0_47, %c0_48] : memref<2x1x32xf32, #tpu.memory_space<vmem>>, vector<1x1x32xf32>
    %140 = vector.shape_cast %139 : vector<1x1x32xf32> to vector<1x32xf32>
    %141 = vector.broadcast %140 : vector<1x32xf32> to vector<16x32xf32>
    %142 = arith.addf %138, %141 : vector<16x32xf32>
    %143 = arith.addf %69, %142 : vector<16x32xf32>
    %c0_49 = arith.constant 0 : index
    %c0_50 = arith.constant 0 : index
    %c0_51 = arith.constant 0 : index
    %144 = vector.load %arg13[%c0_49, %c0_50, %c0_51] : memref<2x1x32xf32, #tpu.memory_space<vmem>>, vector<1x1x32xf32>
    %145 = vector.shape_cast %144 : vector<1x1x32xf32> to vector<1x32xf32>
    %c0_52 = arith.constant 0 : index
    %c0_53 = arith.constant 0 : index
    %c0_54 = arith.constant 0 : index
    %146 = vector.load %arg14[%c0_52, %c0_53, %c0_54] : memref<2x1x32xf32, #tpu.memory_space<vmem>>, vector<1x1x32xf32>
    %147 = vector.shape_cast %146 : vector<1x1x32xf32> to vector<1x32xf32>
    %cst_55 = arith.constant dense<0.000000e+00> : vector<16xf32>
    %148 = vector.multi_reduction <add>, %143, %cst_55 [1] : vector<16x32xf32> to vector<16xf32>
    %149 = vector.shape_cast %148 : vector<16xf32> to vector<16x1xf32>
    %cst_56 = arith.constant 3.200000e+01 : f32
    %150 = vector.broadcast %cst_56 : f32 to vector<16x1xf32>
    %151 = arith.divf %149, %150 : vector<16x1xf32>
    %152 = vector.broadcast %151 : vector<16x1xf32> to vector<16x32xf32>
    %153 = arith.subf %143, %152 : vector<16x32xf32>
    %154 = arith.mulf %153, %153 : vector<16x32xf32>
    %cst_57 = arith.constant dense<0.000000e+00> : vector<16xf32>
    %155 = vector.multi_reduction <add>, %154, %cst_57 [1] : vector<16x32xf32> to vector<16xf32>
    %156 = vector.shape_cast %155 : vector<16xf32> to vector<16x1xf32>
    %cst_58 = arith.constant 3.200000e+01 : f32
    %157 = vector.broadcast %cst_58 : f32 to vector<16x1xf32>
    %158 = arith.divf %156, %157 : vector<16x1xf32>
    %159 = vector.broadcast %151 : vector<16x1xf32> to vector<16x32xf32>
    %160 = arith.subf %143, %159 : vector<16x32xf32>
    %cst_59 = arith.constant 9.99999974E-6 : f32
    %161 = vector.broadcast %cst_59 : f32 to vector<16x1xf32>
    %162 = arith.addf %158, %161 : vector<16x1xf32>
    %163 = math.rsqrt %162 : vector<16x1xf32>
    %164 = vector.broadcast %163 : vector<16x1xf32> to vector<16x32xf32>
    %165 = arith.mulf %160, %164 : vector<16x32xf32>
    %166 = vector.broadcast %145 : vector<1x32xf32> to vector<16x32xf32>
    %167 = arith.mulf %165, %166 : vector<16x32xf32>
    %168 = vector.broadcast %147 : vector<1x32xf32> to vector<16x32xf32>
    %169 = arith.addf %167, %168 : vector<16x32xf32>
    %170 = arith.truncf %169 : vector<16x32xf32> to vector<16x32xbf16>
    %c0_60 = arith.constant 0 : index
    %c0_61 = arith.constant 0 : index
    %c0_62 = arith.constant 0 : index
    %171 = vector.load %arg15[%c0_60, %c0_61, %c0_62] : memref<2x32x64xbf16, #tpu.memory_space<vmem>>, vector<1x32x64xbf16>
    %172 = vector.shape_cast %171 : vector<1x32x64xbf16> to vector<32x64xbf16>
    %cst_63 = arith.constant dense<0.000000e+00> : vector<16x64xf32>
    %173 = tpu.matmul %170, %172, %cst_63 {dimension_numbers = #tpu.dot_dimension_numbers<[1], [0], [0], [1], [0, 0, 1, 1], [], []>} : vector<16x32xbf16>, vector<32x64xbf16>, vector<16x64xf32> -> vector<16x64xf32>
    %c0_64 = arith.constant 0 : index
    %c0_65 = arith.constant 0 : index
    %c0_66 = arith.constant 0 : index
    %174 = vector.load %arg16[%c0_64, %c0_65, %c0_66] : memref<2x1x64xf32, #tpu.memory_space<vmem>>, vector<1x1x64xf32>
    %175 = vector.shape_cast %174 : vector<1x1x64xf32> to vector<1x64xf32>
    %176 = vector.broadcast %175 : vector<1x64xf32> to vector<16x64xf32>
    %177 = arith.addf %173, %176 : vector<16x64xf32>
    %178 = arith.mulf %177, %177 : vector<16x64xf32>
    %179 = arith.mulf %177, %178 : vector<16x64xf32>
    %cst_67 = arith.constant 4.471500e-02 : f32
    %180 = vector.broadcast %cst_67 : f32 to vector<16x64xf32>
    %181 = arith.mulf %180, %179 : vector<16x64xf32>
    %182 = arith.addf %177, %181 : vector<16x64xf32>
    %cst_68 = arith.constant 0.797884583 : f32
    %183 = vector.broadcast %cst_68 : f32 to vector<16x64xf32>
    %184 = arith.mulf %183, %182 : vector<16x64xf32>
    %185 = math.tanh %184 : vector<16x64xf32>
    %cst_69 = arith.constant 1.000000e+00 : f32
    %186 = vector.broadcast %cst_69 : f32 to vector<16x64xf32>
    %187 = arith.addf %186, %185 : vector<16x64xf32>
    %cst_70 = arith.constant 5.000000e-01 : f32
    %188 = vector.broadcast %cst_70 : f32 to vector<16x64xf32>
    %189 = arith.mulf %188, %187 : vector<16x64xf32>
    %190 = arith.mulf %177, %189 : vector<16x64xf32>
    %191 = arith.truncf %190 : vector<16x64xf32> to vector<16x64xbf16>
    %c0_71 = arith.constant 0 : index
    %c0_72 = arith.constant 0 : index
    %c0_73 = arith.constant 0 : index
    %192 = vector.load %arg17[%c0_71, %c0_72, %c0_73] : memref<2x64x32xbf16, #tpu.memory_space<vmem>>, vector<1x64x32xbf16>
    %193 = vector.shape_cast %192 : vector<1x64x32xbf16> to vector<64x32xbf16>
    %cst_74 = arith.constant dense<0.000000e+00> : vector<16x32xf32>
    %194 = tpu.matmul %191, %193, %cst_74 {dimension_numbers = #tpu.dot_dimension_numbers<[1], [0], [0], [1], [0, 0, 1, 1], [], []>} : vector<16x64xbf16>, vector<64x32xbf16>, vector<16x32xf32> -> vector<16x32xf32>
    %c0_75 = arith.constant 0 : index
    %c0_76 = arith.constant 0 : index
    %c0_77 = arith.constant 0 : index
    %195 = vector.load %arg18[%c0_75, %c0_76, %c0_77] : memref<2x1x32xf32, #tpu.memory_space<vmem>>, vector<1x1x32xf32>
    %196 = vector.shape_cast %195 : vector<1x1x32xf32> to vector<1x32xf32>
    %197 = vector.broadcast %196 : vector<1x32xf32> to vector<16x32xf32>
    %198 = arith.addf %194, %197 : vector<16x32xf32>
    %199 = arith.addf %169, %198 : vector<16x32xf32>
    %c0_78 = arith.constant 0 : index
    %c0_79 = arith.constant 0 : index
    %c0_80 = arith.constant 0 : index
    %200 = vector.load %arg19[%c0_78, %c0_79, %c0_80] : memref<2x1x32xf32, #tpu.memory_space<vmem>>, vector<1x1x32xf32>
    %201 = vector.shape_cast %200 : vector<1x1x32xf32> to vector<1x32xf32>
    %c0_81 = arith.constant 0 : index
    %c0_82 = arith.constant 0 : index
    %c0_83 = arith.constant 0 : index
    %202 = vector.load %arg20[%c0_81, %c0_82, %c0_83] : memref<2x1x32xf32, #tpu.memory_space<vmem>>, vector<1x1x32xf32>
    %203 = vector.shape_cast %202 : vector<1x1x32xf32> to vector<1x32xf32>
    %cst_84 = arith.constant dense<0.000000e+00> : vector<16xf32>
    %204 = vector.multi_reduction <add>, %199, %cst_84 [1] : vector<16x32xf32> to vector<16xf32>
    %205 = vector.shape_cast %204 : vector<16xf32> to vector<16x1xf32>
    %cst_85 = arith.constant 3.200000e+01 : f32
    %206 = vector.broadcast %cst_85 : f32 to vector<16x1xf32>
    %207 = arith.divf %205, %206 : vector<16x1xf32>
    %208 = vector.broadcast %207 : vector<16x1xf32> to vector<16x32xf32>
    %209 = arith.subf %199, %208 : vector<16x32xf32>
    %210 = arith.mulf %209, %209 : vector<16x32xf32>
    %cst_86 = arith.constant dense<0.000000e+00> : vector<16xf32>
    %211 = vector.multi_reduction <add>, %210, %cst_86 [1] : vector<16x32xf32> to vector<16xf32>
    %212 = vector.shape_cast %211 : vector<16xf32> to vector<16x1xf32>
    %cst_87 = arith.constant 3.200000e+01 : f32
    %213 = vector.broadcast %cst_87 : f32 to vector<16x1xf32>
    %214 = arith.divf %212, %213 : vector<16x1xf32>
    %215 = vector.broadcast %207 : vector<16x1xf32> to vector<16x32xf32>
    %216 = arith.subf %199, %215 : vector<16x32xf32>
    %cst_88 = arith.constant 9.99999974E-6 : f32
    %217 = vector.broadcast %cst_88 : f32 to vector<16x1xf32>
    %218 = arith.addf %214, %217 : vector<16x1xf32>
    %219 = math.rsqrt %218 : vector<16x1xf32>
    %220 = vector.broadcast %219 : vector<16x1xf32> to vector<16x32xf32>
    %221 = arith.mulf %216, %220 : vector<16x32xf32>
    %222 = vector.broadcast %201 : vector<1x32xf32> to vector<16x32xf32>
    %223 = arith.mulf %221, %222 : vector<16x32xf32>
    %224 = vector.broadcast %203 : vector<1x32xf32> to vector<16x32xf32>
    %225 = arith.addf %223, %224 : vector<16x32xf32>
    %226 = arith.truncf %225 : vector<16x32xf32> to vector<16x32xbf16>
    %c1 = arith.constant 1 : index
    %c0_89 = arith.constant 0 : index
    %c0_90 = arith.constant 0 : index
    %227 = vector.load %arg9[%c1, %c0_89, %c0_90] : memref<2x32x96xbf16, #tpu.memory_space<vmem>>, vector<1x32x96xbf16>
    %228 = vector.shape_cast %227 : vector<1x32x96xbf16> to vector<32x96xbf16>
    %cst_91 = arith.constant dense<0.000000e+00> : vector<16x96xf32>
    %229 = tpu.matmul %226, %228, %cst_91 {dimension_numbers = #tpu.dot_dimension_numbers<[1], [0], [0], [1], [0, 0, 1, 1], [], []>} : vector<16x32xbf16>, vector<32x96xbf16>, vector<16x96xf32> -> vector<16x96xf32>
    %c1_92 = arith.constant 1 : index
    %c0_93 = arith.constant 0 : index
    %c0_94 = arith.constant 0 : index
    %230 = vector.load %arg10[%c1_92, %c0_93, %c0_94] : memref<2x1x96xf32, #tpu.memory_space<vmem>>, vector<1x1x96xf32>
    %231 = vector.shape_cast %230 : vector<1x1x96xf32> to vector<1x96xf32>
    %232 = vector.broadcast %231 : vector<1x96xf32> to vector<16x96xf32>
    %233 = arith.addf %229, %232 : vector<16x96xf32>
    %234 = arith.truncf %233 : vector<16x96xf32> to vector<16x96xbf16>
    %235 = vector.extract_strided_slice %234 {offsets = [0, 0], sizes = [16, 8], strides = [1, 1]} : vector<16x96xbf16> to vector<16x8xbf16>
    %236 = vector.extract_strided_slice %234 {offsets = [0, 8], sizes = [16, 8], strides = [1, 1]} : vector<16x96xbf16> to vector<16x8xbf16>
    %237 = vector.extract_strided_slice %234 {offsets = [0, 16], sizes = [16, 8], strides = [1, 1]} : vector<16x96xbf16> to vector<16x8xbf16>
    %238 = vector.extract_strided_slice %234 {offsets = [0, 24], sizes = [16, 8], strides = [1, 1]} : vector<16x96xbf16> to vector<16x8xbf16>
    %239 = vector.shape_cast %235 : vector<16x8xbf16> to vector<1x16x8xbf16>
    %240 = vector.shape_cast %236 : vector<16x8xbf16> to vector<1x16x8xbf16>
    %241 = vector.shape_cast %237 : vector<16x8xbf16> to vector<1x16x8xbf16>
    %242 = vector.shape_cast %238 : vector<16x8xbf16> to vector<1x16x8xbf16>
    %243 = tpu.concatenate %239, %240, %241, %242 in 0 : vector<1x16x8xbf16>, vector<1x16x8xbf16>, vector<1x16x8xbf16>, vector<1x16x8xbf16> -> vector<4x16x8xbf16>
    %244 = vector.extract_strided_slice %234 {offsets = [0, 32], sizes = [16, 8], strides = [1, 1]} : vector<16x96xbf16> to vector<16x8xbf16>
    %245 = vector.extract_strided_slice %234 {offsets = [0, 40], sizes = [16, 8], strides = [1, 1]} : vector<16x96xbf16> to vector<16x8xbf16>
    %246 = vector.extract_strided_slice %234 {offsets = [0, 48], sizes = [16, 8], strides = [1, 1]} : vector<16x96xbf16> to vector<16x8xbf16>
    %247 = vector.extract_strided_slice %234 {offsets = [0, 56], sizes = [16, 8], strides = [1, 1]} : vector<16x96xbf16> to vector<16x8xbf16>
    %248 = vector.shape_cast %244 : vector<16x8xbf16> to vector<1x16x8xbf16>
    %249 = vector.shape_cast %245 : vector<16x8xbf16> to vector<1x16x8xbf16>
    %250 = vector.shape_cast %246 : vector<16x8xbf16> to vector<1x16x8xbf16>
    %251 = vector.shape_cast %247 : vector<16x8xbf16> to vector<1x16x8xbf16>
    %252 = tpu.concatenate %248, %249, %250, %251 in 0 : vector<1x16x8xbf16>, vector<1x16x8xbf16>, vector<1x16x8xbf16>, vector<1x16x8xbf16> -> vector<4x16x8xbf16>
    %253 = vector.extract_strided_slice %234 {offsets = [0, 64], sizes = [16, 8], strides = [1, 1]} : vector<16x96xbf16> to vector<16x8xbf16>
    %254 = vector.extract_strided_slice %234 {offsets = [0, 72], sizes = [16, 8], strides = [1, 1]} : vector<16x96xbf16> to vector<16x8xbf16>
    %255 = vector.extract_strided_slice %234 {offsets = [0, 80], sizes = [16, 8], strides = [1, 1]} : vector<16x96xbf16> to vector<16x8xbf16>
    %256 = vector.extract_strided_slice %234 {offsets = [0, 88], sizes = [16, 8], strides = [1, 1]} : vector<16x96xbf16> to vector<16x8xbf16>
    %257 = vector.shape_cast %253 : vector<16x8xbf16> to vector<1x16x8xbf16>
    %258 = vector.shape_cast %254 : vector<16x8xbf16> to vector<1x16x8xbf16>
    %259 = vector.shape_cast %255 : vector<16x8xbf16> to vector<1x16x8xbf16>
    %260 = vector.shape_cast %256 : vector<16x8xbf16> to vector<1x16x8xbf16>
    %261 = tpu.concatenate %257, %258, %259, %260 in 0 : vector<1x16x8xbf16>, vector<1x16x8xbf16>, vector<1x16x8xbf16>, vector<1x16x8xbf16> -> vector<4x16x8xbf16>
    "tpu.trace_start"() <{level = 10 : i32, message = "hqd,hkd->hqk"}> : () -> ()
    %cst_95 = arith.constant dense<0.000000e+00> : vector<4x16x16xf32>
    %262 = tpu.matmul %243, %252, %cst_95 {dimension_numbers = #tpu.dot_dimension_numbers<[2], [2], [1], [1], [0, 0, 0, 1, 1, 1], [0], [0]>} : vector<4x16x8xbf16>, vector<4x16x8xbf16>, vector<4x16x16xf32> -> vector<4x16x16xf32>
    "tpu.trace_stop"() : () -> ()
    %263 = vector.shape_cast %73 : vector<16x16xf32> to vector<1x16x16xf32>
    %264 = vector.broadcast %263 : vector<1x16x16xf32> to vector<4x16x16xf32>
    %265 = arith.addf %262, %264 : vector<4x16x16xf32>
    %cst_96 = arith.constant dense<0xFF800000> : vector<4x16xf32>
    %266 = vector.multi_reduction <maximumf>, %265, %cst_96 [2] : vector<4x16x16xf32> to vector<4x16xf32>
    %267 = vector.shape_cast %266 : vector<4x16xf32> to vector<4x16x1xf32>
    %268 = vector.broadcast %267 : vector<4x16x1xf32> to vector<4x16x16xf32>
    %269 = arith.subf %265, %268 : vector<4x16x16xf32>
    %270 = math.exp %269 : vector<4x16x16xf32>
    %cst_97 = arith.constant dense<0.000000e+00> : vector<4x16xf32>
    %271 = vector.multi_reduction <add>, %270, %cst_97 [2] : vector<4x16x16xf32> to vector<4x16xf32>
    %272 = vector.shape_cast %271 : vector<4x16xf32> to vector<4x16x1xf32>
    %273 = tpu.reciprocal %272 {approx = true} : vector<4x16x1xf32> -> vector<4x16x1xf32>
    %274 = vector.broadcast %273 : vector<4x16x1xf32> to vector<4x16x16xf32>
    %275 = arith.mulf %270, %274 : vector<4x16x16xf32>
    %276 = arith.truncf %275 : vector<4x16x16xf32> to vector<4x16x16xbf16>
    "tpu.trace_start"() <{level = 10 : i32, message = "hqk,hkd->hqd"}> : () -> ()
    %cst_98 = arith.constant dense<0.000000e+00> : vector<4x16x8xf32>
    %277 = tpu.matmul %276, %261, %cst_98 {dimension_numbers = #tpu.dot_dimension_numbers<[2], [1], [1], [2], [0, 0, 0, 1, 1, 2], [0], [0]>} : vector<4x16x16xbf16>, vector<4x16x8xbf16>, vector<4x16x8xf32> -> vector<4x16x8xf32>
    "tpu.trace_stop"() : () -> ()
    %278 = vector.extract_strided_slice %277 {offsets = [0, 0, 0], sizes = [1, 16, 8], strides = [1, 1, 1]} : vector<4x16x8xf32> to vector<1x16x8xf32>
    %279 = vector.shape_cast %278 : vector<1x16x8xf32> to vector<16x8xf32>
    %280 = vector.extract_strided_slice %277 {offsets = [1, 0, 0], sizes = [1, 16, 8], strides = [1, 1, 1]} : vector<4x16x8xf32> to vector<1x16x8xf32>
    %281 = vector.shape_cast %280 : vector<1x16x8xf32> to vector<16x8xf32>
    %282 = vector.extract_strided_slice %277 {offsets = [2, 0, 0], sizes = [1, 16, 8], strides = [1, 1, 1]} : vector<4x16x8xf32> to vector<1x16x8xf32>
    %283 = vector.shape_cast %282 : vector<1x16x8xf32> to vector<16x8xf32>
    %284 = vector.extract_strided_slice %277 {offsets = [3, 0, 0], sizes = [1, 16, 8], strides = [1, 1, 1]} : vector<4x16x8xf32> to vector<1x16x8xf32>
    %285 = vector.shape_cast %284 : vector<1x16x8xf32> to vector<16x8xf32>
    %286 = tpu.concatenate %279, %281, %283, %285 in 1 : vector<16x8xf32>, vector<16x8xf32>, vector<16x8xf32>, vector<16x8xf32> -> vector<16x32xf32>
    %287 = arith.truncf %286 : vector<16x32xf32> to vector<16x32xbf16>
    %c1_99 = arith.constant 1 : index
    %c0_100 = arith.constant 0 : index
    %c0_101 = arith.constant 0 : index
    %288 = vector.load %arg11[%c1_99, %c0_100, %c0_101] : memref<2x32x32xbf16, #tpu.memory_space<vmem>>, vector<1x32x32xbf16>
    %289 = vector.shape_cast %288 : vector<1x32x32xbf16> to vector<32x32xbf16>
    %cst_102 = arith.constant dense<0.000000e+00> : vector<16x32xf32>
    %290 = tpu.matmul %287, %289, %cst_102 {dimension_numbers = #tpu.dot_dimension_numbers<[1], [0], [0], [1], [0, 0, 1, 1], [], []>} : vector<16x32xbf16>, vector<32x32xbf16>, vector<16x32xf32> -> vector<16x32xf32>
    %c1_103 = arith.constant 1 : index
    %c0_104 = arith.constant 0 : index
    %c0_105 = arith.constant 0 : index
    %291 = vector.load %arg12[%c1_103, %c0_104, %c0_105] : memref<2x1x32xf32, #tpu.memory_space<vmem>>, vector<1x1x32xf32>
    %292 = vector.shape_cast %291 : vector<1x1x32xf32> to vector<1x32xf32>
    %293 = vector.broadcast %292 : vector<1x32xf32> to vector<16x32xf32>
    %294 = arith.addf %290, %293 : vector<16x32xf32>
    %295 = arith.addf %225, %294 : vector<16x32xf32>
    %c1_106 = arith.constant 1 : index
    %c0_107 = arith.constant 0 : index
    %c0_108 = arith.constant 0 : index
    %296 = vector.load %arg13[%c1_106, %c0_107, %c0_108] : memref<2x1x32xf32, #tpu.memory_space<vmem>>, vector<1x1x32xf32>
    %297 = vector.shape_cast %296 : vector<1x1x32xf32> to vector<1x32xf32>
    %c1_109 = arith.constant 1 : index
    %c0_110 = arith.constant 0 : index
    %c0_111 = arith.constant 0 : index
    %298 = vector.load %arg14[%c1_109, %c0_110, %c0_111] : memref<2x1x32xf32, #tpu.memory_space<vmem>>, vector<1x1x32xf32>
    %299 = vector.shape_cast %298 : vector<1x1x32xf32> to vector<1x32xf32>
    %cst_112 = arith.constant dense<0.000000e+00> : vector<16xf32>
    %300 = vector.multi_reduction <add>, %295, %cst_112 [1] : vector<16x32xf32> to vector<16xf32>
    %301 = vector.shape_cast %300 : vector<16xf32> to vector<16x1xf32>
    %cst_113 = arith.constant 3.200000e+01 : f32
    %302 = vector.broadcast %cst_113 : f32 to vector<16x1xf32>
    %303 = arith.divf %301, %302 : vector<16x1xf32>
    %304 = vector.broadcast %303 : vector<16x1xf32> to vector<16x32xf32>
    %305 = arith.subf %295, %304 : vector<16x32xf32>
    %306 = arith.mulf %305, %305 : vector<16x32xf32>
    %cst_114 = arith.constant dense<0.000000e+00> : vector<16xf32>
    %307 = vector.multi_reduction <add>, %306, %cst_114 [1] : vector<16x32xf32> to vector<16xf32>
    %308 = vector.shape_cast %307 : vector<16xf32> to vector<16x1xf32>
    %cst_115 = arith.constant 3.200000e+01 : f32
    %309 = vector.broadcast %cst_115 : f32 to vector<16x1xf32>
    %310 = arith.divf %308, %309 : vector<16x1xf32>
    %311 = vector.broadcast %303 : vector<16x1xf32> to vector<16x32xf32>
    %312 = arith.subf %295, %311 : vector<16x32xf32>
    %cst_116 = arith.constant 9.99999974E-6 : f32
    %313 = vector.broadcast %cst_116 : f32 to vector<16x1xf32>
    %314 = arith.addf %310, %313 : vector<16x1xf32>
    %315 = math.rsqrt %314 : vector<16x1xf32>
    %316 = vector.broadcast %315 : vector<16x1xf32> to vector<16x32xf32>
    %317 = arith.mulf %312, %316 : vector<16x32xf32>
    %318 = vector.broadcast %297 : vector<1x32xf32> to vector<16x32xf32>
    %319 = arith.mulf %317, %318 : vector<16x32xf32>
    %320 = vector.broadcast %299 : vector<1x32xf32> to vector<16x32xf32>
    %321 = arith.addf %319, %320 : vector<16x32xf32>
    %322 = arith.truncf %321 : vector<16x32xf32> to vector<16x32xbf16>
    %c1_117 = arith.constant 1 : index
    %c0_118 = arith.constant 0 : index
    %c0_119 = arith.constant 0 : index
    %323 = vector.load %arg15[%c1_117, %c0_118, %c0_119] : memref<2x32x64xbf16, #tpu.memory_space<vmem>>, vector<1x32x64xbf16>
    %324 = vector.shape_cast %323 : vector<1x32x64xbf16> to vector<32x64xbf16>
    %cst_120 = arith.constant dense<0.000000e+00> : vector<16x64xf32>
    %325 = tpu.matmul %322, %324, %cst_120 {dimension_numbers = #tpu.dot_dimension_numbers<[1], [0], [0], [1], [0, 0, 1, 1], [], []>} : vector<16x32xbf16>, vector<32x64xbf16>, vector<16x64xf32> -> vector<16x64xf32>
    %c1_121 = arith.constant 1 : index
    %c0_122 = arith.constant 0 : index
    %c0_123 = arith.constant 0 : index
    %326 = vector.load %arg16[%c1_121, %c0_122, %c0_123] : memref<2x1x64xf32, #tpu.memory_space<vmem>>, vector<1x1x64xf32>
    %327 = vector.shape_cast %326 : vector<1x1x64xf32> to vector<1x64xf32>
    %328 = vector.broadcast %327 : vector<1x64xf32> to vector<16x64xf32>
    %329 = arith.addf %325, %328 : vector<16x64xf32>
    %330 = arith.mulf %329, %329 : vector<16x64xf32>
    %331 = arith.mulf %329, %330 : vector<16x64xf32>
    %cst_124 = arith.constant 4.471500e-02 : f32
    %332 = vector.broadcast %cst_124 : f32 to vector<16x64xf32>
    %333 = arith.mulf %332, %331 : vector<16x64xf32>
    %334 = arith.addf %329, %333 : vector<16x64xf32>
    %cst_125 = arith.constant 0.797884583 : f32
    %335 = vector.broadcast %cst_125 : f32 to vector<16x64xf32>
    %336 = arith.mulf %335, %334 : vector<16x64xf32>
    %337 = math.tanh %336 : vector<16x64xf32>
    %cst_126 = arith.constant 1.000000e+00 : f32
    %338 = vector.broadcast %cst_126 : f32 to vector<16x64xf32>
    %339 = arith.addf %338, %337 : vector<16x64xf32>
    %cst_127 = arith.constant 5.000000e-01 : f32
    %340 = vector.broadcast %cst_127 : f32 to vector<16x64xf32>
    %341 = arith.mulf %340, %339 : vector<16x64xf32>
    %342 = arith.mulf %329, %341 : vector<16x64xf32>
    %343 = arith.truncf %342 : vector<16x64xf32> to vector<16x64xbf16>
    %c1_128 = arith.constant 1 : index
    %c0_129 = arith.constant 0 : index
    %c0_130 = arith.constant 0 : index
    %344 = vector.load %arg17[%c1_128, %c0_129, %c0_130] : memref<2x64x32xbf16, #tpu.memory_space<vmem>>, vector<1x64x32xbf16>
    %345 = vector.shape_cast %344 : vector<1x64x32xbf16> to vector<64x32xbf16>
    %cst_131 = arith.constant dense<0.000000e+00> : vector<16x32xf32>
    %346 = tpu.matmul %343, %345, %cst_131 {dimension_numbers = #tpu.dot_dimension_numbers<[1], [0], [0], [1], [0, 0, 1, 1], [], []>} : vector<16x64xbf16>, vector<64x32xbf16>, vector<16x32xf32> -> vector<16x32xf32>
    %c1_132 = arith.constant 1 : index
    %c0_133 = arith.constant 0 : index
    %c0_134 = arith.constant 0 : index
    %347 = vector.load %arg18[%c1_132, %c0_133, %c0_134] : memref<2x1x32xf32, #tpu.memory_space<vmem>>, vector<1x1x32xf32>
    %348 = vector.shape_cast %347 : vector<1x1x32xf32> to vector<1x32xf32>
    %349 = vector.broadcast %348 : vector<1x32xf32> to vector<16x32xf32>
    %350 = arith.addf %346, %349 : vector<16x32xf32>
    %351 = arith.addf %321, %350 : vector<16x32xf32>
    %c1_135 = arith.constant 1 : index
    %c0_136 = arith.constant 0 : index
    %c0_137 = arith.constant 0 : index
    %352 = vector.load %arg19[%c1_135, %c0_136, %c0_137] : memref<2x1x32xf32, #tpu.memory_space<vmem>>, vector<1x1x32xf32>
    %353 = vector.shape_cast %352 : vector<1x1x32xf32> to vector<1x32xf32>
    %c1_138 = arith.constant 1 : index
    %c0_139 = arith.constant 0 : index
    %c0_140 = arith.constant 0 : index
    %354 = vector.load %arg20[%c1_138, %c0_139, %c0_140] : memref<2x1x32xf32, #tpu.memory_space<vmem>>, vector<1x1x32xf32>
    %355 = vector.shape_cast %354 : vector<1x1x32xf32> to vector<1x32xf32>
    %cst_141 = arith.constant dense<0.000000e+00> : vector<16xf32>
    %356 = vector.multi_reduction <add>, %351, %cst_141 [1] : vector<16x32xf32> to vector<16xf32>
    %357 = vector.shape_cast %356 : vector<16xf32> to vector<16x1xf32>
    %cst_142 = arith.constant 3.200000e+01 : f32
    %358 = vector.broadcast %cst_142 : f32 to vector<16x1xf32>
    %359 = arith.divf %357, %358 : vector<16x1xf32>
    %360 = vector.broadcast %359 : vector<16x1xf32> to vector<16x32xf32>
    %361 = arith.subf %351, %360 : vector<16x32xf32>
    %362 = arith.mulf %361, %361 : vector<16x32xf32>
    %cst_143 = arith.constant dense<0.000000e+00> : vector<16xf32>
    %363 = vector.multi_reduction <add>, %362, %cst_143 [1] : vector<16x32xf32> to vector<16xf32>
    %364 = vector.shape_cast %363 : vector<16xf32> to vector<16x1xf32>
    %cst_144 = arith.constant 3.200000e+01 : f32
    %365 = vector.broadcast %cst_144 : f32 to vector<16x1xf32>
    %366 = arith.divf %364, %365 : vector<16x1xf32>
    %367 = vector.broadcast %359 : vector<16x1xf32> to vector<16x32xf32>
    %368 = arith.subf %351, %367 : vector<16x32xf32>
    %cst_145 = arith.constant 9.99999974E-6 : f32
    %369 = vector.broadcast %cst_145 : f32 to vector<16x1xf32>
    %370 = arith.addf %366, %369 : vector<16x1xf32>
    %371 = math.rsqrt %370 : vector<16x1xf32>
    %372 = vector.broadcast %371 : vector<16x1xf32> to vector<16x32xf32>
    %373 = arith.mulf %368, %372 : vector<16x32xf32>
    %374 = vector.broadcast %353 : vector<1x32xf32> to vector<16x32xf32>
    %375 = arith.mulf %373, %374 : vector<16x32xf32>
    %376 = vector.broadcast %355 : vector<1x32xf32> to vector<16x32xf32>
    %377 = arith.addf %375, %376 : vector<16x32xf32>
    %378 = vector.extract_strided_slice %377 {offsets = [0, 0], sizes = [1, 32], strides = [1, 1]} : vector<16x32xf32> to vector<1x32xf32>
    %379 = arith.truncf %378 : vector<1x32xf32> to vector<1x32xbf16>
    %c0_146 = arith.constant 0 : index
    %c0_147 = arith.constant 0 : index
    %380 = vector.load %arg21[%c0_146, %c0_147] : memref<32x128xbf16, #tpu.memory_space<vmem>>, vector<32x128xbf16>
    %cst_148 = arith.constant dense<0.000000e+00> : vector<1x128xf32>
    %381 = tpu.matmul %379, %380, %cst_148 {dimension_numbers = #tpu.dot_dimension_numbers<[1], [0], [0], [1], [0, 0, 1, 1], [], []>} : vector<1x32xbf16>, vector<32x128xbf16>, vector<1x128xf32> -> vector<1x128xf32>
    %c0_149 = arith.constant 0 : index
    %c0_150 = arith.constant 0 : index
    %382 = vector.load %arg22[%c0_149, %c0_150] : memref<1x128xf32, #tpu.memory_space<vmem>>, vector<1x128xf32>
    %383 = arith.addf %381, %382 : vector<1x128xf32>
    %384 = math.tanh %383 : vector<1x128xf32>
    %c0_151 = arith.constant 0 : index
    %c0_152 = arith.constant 0 : index
    %c0_153 = arith.constant 0 : index
    %385 = vector.load %arg23[%c0_151, %c0_152, %c0_153] : memref<1x1x128xf32, #tpu.memory_space<vmem>>, vector<1x1x128xf32>
    %386 = vector.shape_cast %385 : vector<1x1x128xf32> to vector<1x128xf32>
    %387 = vector.shape_cast %384 : vector<1x128xf32> to vector<1x1x128xf32>
    tpu.vector_store %arg23[%c0_151, %c0_152, %c0_153], %387 {strides = array<i32>} : memref<1x1x128xf32, #tpu.memory_space<vmem>>, vector<1x1x128xf32>,
    return
  }
  func.func @transform_0(%arg0: i32) -> (i32, i32, i32) {
    %c0_i32 = arith.constant 0 : i32
    %c0_i32_0 = arith.constant 0 : i32
    %c0_i32_1 = arith.constant 0 : i32
    return %arg0, %c0_i32, %c0_i32_0 : i32, i32, i32
  }
  func.func @transform_1(%arg0: i32) -> (i32, i32, i32) {
    %c0_i32 = arith.constant 0 : i32
    %c0_i32_0 = arith.constant 0 : i32
    %c0_i32_1 = arith.constant 0 : i32
    return %arg0, %c0_i32, %c0_i32_0 : i32, i32, i32
  }
  func.func @transform_2(%arg0: i32) -> (i32, i32, i32) {
    %c0_i32 = arith.constant 0 : i32
    %c0_i32_0 = arith.constant 0 : i32
    %c0_i32_1 = arith.constant 0 : i32
    return %arg0, %c0_i32, %c0_i32_0 : i32, i32, i32
  }
  func.func @transform_3(%arg0: i32) -> (i32, i32, i32) {
    %c0_i32 = arith.constant 0 : i32
    %c0_i32_0 = arith.constant 0 : i32
    %c0_i32_1 = arith.constant 0 : i32
    return %arg0, %c0_i32, %c0_i32_0 : i32, i32, i32
  }
  func.func @transform_4(%arg0: i32) -> (i32, i32, i32) {
    %c0_i32 = arith.constant 0 : i32
    %c0_i32_0 = arith.constant 0 : i32
    %c0_i32_1 = arith.constant 0 : i32
    return %arg0, %c0_i32, %c0_i32_0 : i32, i32, i32
  }
  func.func @transform_5(%arg0: i32) -> (i32, i32) {
    %c0_i32 = arith.constant 0 : i32
    %c0_i32_0 = arith.constant 0 : i32
    %c0_i32_1 = arith.constant 0 : i32
    return %c0_i32, %c0_i32_0 : i32, i32
  }
  func.func @transform_6(%arg0: i32) -> (i32, i32) {
    %c0_i32 = arith.constant 0 : i32
    %c0_i32_0 = arith.constant 0 : i32
    %c0_i32_1 = arith.constant 0 : i32
    return %c0_i32, %c0_i32_0 : i32, i32
  }
  func.func @transform_7(%arg0: i32) -> (i32, i32) {
    %c0_i32 = arith.constant 0 : i32
    %c0_i32_0 = arith.constant 0 : i32
    %c0_i32_1 = arith.constant 0 : i32
    return %c0_i32, %c0_i32_0 : i32, i32
  }
  func.func @transform_8(%arg0: i32) -> (i32, i32, i32) {
    %c0_i32 = arith.constant 0 : i32
    %c0_i32_0 = arith.constant 0 : i32
    %c0_i32_1 = arith.constant 0 : i32
    %c0_i32_2 = arith.constant 0 : i32
    return %c0_i32, %c0_i32_0, %c0_i32_1 : i32, i32, i32
  }
  func.func @transform_9(%arg0: i32) -> (i32, i32, i32) {
    %c0_i32 = arith.constant 0 : i32
    %c0_i32_0 = arith.constant 0 : i32
    %c0_i32_1 = arith.constant 0 : i32
    %c0_i32_2 = arith.constant 0 : i32
    return %c0_i32, %c0_i32_0, %c0_i32_1 : i32, i32, i32
  }
  func.func @transform_10(%arg0: i32) -> (i32, i32, i32) {
    %c0_i32 = arith.constant 0 : i32
    %c0_i32_0 = arith.constant 0 : i32
    %c0_i32_1 = arith.constant 0 : i32
    %c0_i32_2 = arith.constant 0 : i32
    return %c0_i32, %c0_i32_0, %c0_i32_1 : i32, i32, i32
  }
  func.func @transform_11(%arg0: i32) -> (i32, i32, i32) {
    %c0_i32 = arith.constant 0 : i32
    %c0_i32_0 = arith.constant 0 : i32
    %c0_i32_1 = arith.constant 0 : i32
    %c0_i32_2 = arith.constant 0 : i32
    return %c0_i32, %c0_i32_0, %c0_i32_1 : i32, i32, i32
  }
  func.func @transform_12(%arg0: i32) -> (i32, i32, i32) {
    %c0_i32 = arith.constant 0 : i32
    %c0_i32_0 = arith.constant 0 : i32
    %c0_i32_1 = arith.constant 0 : i32
    %c0_i32_2 = arith.constant 0 : i32
    return %c0_i32, %c0_i32_0, %c0_i32_1 : i32, i32, i32
  }
  func.func @transform_13(%arg0: i32) -> (i32, i32, i32) {
    %c0_i32 = arith.constant 0 : i32
    %c0_i32_0 = arith.constant 0 : i32
    %c0_i32_1 = arith.constant 0 : i32
    %c0_i32_2 = arith.constant 0 : i32
    return %c0_i32, %c0_i32_0, %c0_i32_1 : i32, i32, i32
  }
  func.func @transform_14(%arg0: i32) -> (i32, i32, i32) {
    %c0_i32 = arith.constant 0 : i32
    %c0_i32_0 = arith.constant 0 : i32
    %c0_i32_1 = arith.constant 0 : i32
    %c0_i32_2 = arith.constant 0 : i32
    return %c0_i32, %c0_i32_0, %c0_i32_1 : i32, i32, i32
  }
  func.func @transform_15(%arg0: i32) -> (i32, i32, i32) {
    %c0_i32 = arith.constant 0 : i32
    %c0_i32_0 = arith.constant 0 : i32
    %c0_i32_1 = arith.constant 0 : i32
    %c0_i32_2 = arith.constant 0 : i32
    return %c0_i32, %c0_i32_0, %c0_i32_1 : i32, i32, i32
  }
  func.func @transform_16(%arg0: i32) -> (i32, i32, i32) {
    %c0_i32 = arith.constant 0 : i32
    %c0_i32_0 = arith.constant 0 : i32
    %c0_i32_1 = arith.constant 0 : i32
    %c0_i32_2 = arith.constant 0 : i32
    return %c0_i32, %c0_i32_0, %c0_i32_1 : i32, i32, i32
  }
  func.func @transform_17(%arg0: i32) -> (i32, i32, i32) {
    %c0_i32 = arith.constant 0 : i32
    %c0_i32_0 = arith.constant 0 : i32
    %c0_i32_1 = arith.constant 0 : i32
    %c0_i32_2 = arith.constant 0 : i32
    return %c0_i32, %c0_i32_0, %c0_i32_1 : i32, i32, i32
  }
  func.func @transform_18(%arg0: i32) -> (i32, i32, i32) {
    %c0_i32 = arith.constant 0 : i32
    %c0_i32_0 = arith.constant 0 : i32
    %c0_i32_1 = arith.constant 0 : i32
    %c0_i32_2 = arith.constant 0 : i32
    return %c0_i32, %c0_i32_0, %c0_i32_1 : i32, i32, i32
  }
  func.func @transform_19(%arg0: i32) -> (i32, i32, i32) {
    %c0_i32 = arith.constant 0 : i32
    %c0_i32_0 = arith.constant 0 : i32
    %c0_i32_1 = arith.constant 0 : i32
    %c0_i32_2 = arith.constant 0 : i32
    return %c0_i32, %c0_i32_0, %c0_i32_1 : i32, i32, i32
  }
  func.func @transform_20(%arg0: i32) -> (i32, i32) {
    %c0_i32 = arith.constant 0 : i32
    %c0_i32_0 = arith.constant 0 : i32
    %c0_i32_1 = arith.constant 0 : i32
    return %c0_i32, %c0_i32_0 : i32, i32
  }
  func.func @transform_21(%arg0: i32) -> (i32, i32) {
    %c0_i32 = arith.constant 0 : i32
    %c0_i32_0 = arith.constant 0 : i32
    %c0_i32_1 = arith.constant 0 : i32
    return %c0_i32, %c0_i32_0 : i32, i32
  }
  func.func @transform_22(%arg0: i32) -> (i32, i32, i32) {
    %c0_i32 = arith.constant 0 : i32
    %c0_i32_0 = arith.constant 0 : i32
    %c0_i32_1 = arith.constant 0 : i32
    return %arg0, %c0_i32, %c0_i32_0 : i32, i32, i32
  }
}

</mosaic_0001>

<bundles_post_ra>
// kernel: integrated_model_forward.1
= control target key start
LH: loop header
LB: loop body
LE: loop exit
PB: predicated region body
PF: predicated region fallthrough
CT: control target
= control target key end

     0   :  { %s3466_s0 = inlined_call_operand.vmem [shape: s32[2,16,1], index: 0, kind: input, shape index: {}]   ;;  %s3467_s1 = inlined_call_operand.vmem [shape: s32[2,1,16], index: 1, kind: input, shape index: {}]   ;;  %s3468_s2 = inlined_call_operand.vmem [shape: f32[2,16,16], index: 2, kind: input, shape index: {}]   ;;  %s3469_s3 = inlined_call_operand.vmem [shape: f32[2,16,32], index: 3, kind: input, shape index: {}]   ;;  %s3470_s4 = inlined_call_operand.vmem [shape: f32[2,16,32], index: 4, kind: input, shape index: {}]   ;;  %s3471_s5 = inlined_call_operand.vmem [shape: f32[1,32], index: 5, kind: input, shape index: {}]   ;;  %s3472_s6 = inlined_call_operand.vmem [shape: f32[1,32], index: 6, kind: input, shape index: {}]   ;;  %s3473_s7 = inlined_call_operand.vmem [shape: f32[1,32], index: 7, kind: input, shape index: {}]   ;;  %s3474_s8 = inlined_call_operand.vmem [shape: bf16[2,32,96], index: 8, kind: input, shape index: {}]   ;;  %s3475_s9 = inlined_call_operand.vmem [shape: f32[2,1,96], index: 9, kind: input, shape index: {}]   ;;  %s3476_s10 = inlined_call_operand.vmem [shape: bf16[2,32,32], index: 10, kind: input, shape index: {}]   ;;  %s3477_s11 = inlined_call_operand.vmem [shape: f32[2,1,32], index: 11, kind: input, shape index: {}]   ;;  %s3478_s12 = inlined_call_operand.vmem [shape: f32[2,1,32], index: 12, kind: input, shape index: {}]   ;;  %s3479_s13 = inlined_call_operand.vmem [shape: f32[2,1,32], index: 13, kind: input, shape index: {}]   ;;  %s3480_s14 = inlined_call_operand.vmem [shape: bf16[2,32,64], index: 14, kind: input, shape index: {}]   ;;  %s3481_s15 = inlined_call_operand.vmem [shape: f32[2,1,64], index: 15, kind: input, shape index: {}]   ;;  %s3482_s16 = inlined_call_operand.vmem [shape: bf16[2,64,32], index: 16, kind: input, shape index: {}]   ;;  %s3483_s17 = inlined_call_operand.vmem [shape: f32[2,1,32], index: 17, kind: input, shape index: {}]   ;;  %s3484_s18 = inlined_call_operand.vmem [shape: f32[2,1,32], index: 18, kind: input, shape index: {}]   ;;  %s3485_s19 = inlined_call_operand.vmem [shape: f32[2,1,32], index: 19, kind: input, shape index: {}]   ;;  %s3486_s20 = inlined_call_operand.vmem [shape: bf16[32,128], index: 20, kind: input, shape index: {}]   ;;  %s3487_s21 = inlined_call_operand.vmem [shape: f32[1,128], index: 21, kind: input, shape index: {}]   ;;  %s3488_s22 = inlined_call_operand.hbm [shape: f32[2,1,128], index: 22, kind: output, shape index: {}]  }
   0x1   :  { %3504 = sst [smem:[#allocation11_spill]] %s3466_s0 }
   0x2   :  { %3505 = sst [smem:[#allocation12_spill]] %s3467_s1 }
   0x3   :  { %3506 = sst [smem:[#allocation13_spill]] %s3468_s2 }
   0x4   :  { %3507 = sst [smem:[#allocation14_spill]] %s3469_s3 }
   0x5   :  { %3508 = sst [smem:[#allocation15_spill]] %s3470_s4 }
   0x6   :  { %3509 = sst [smem:[#allocation16_spill]] %s3471_s5 }
   0x7   :  { %3510 = sst [smem:[#allocation17_spill]] %s3472_s6 }
   0x8   :  { %3511 = sst [smem:[#allocation18_spill]] %s3473_s7 }
   0x9   :  { %27 = vsyncpa [#allocation3], 0 }
   0xa   :  { %29 = vsyncpa [#allocation3 + $0x1], 0  ;;  %s2957_s3 = smov 0   ;;  %s2959_s28 = smov 0  }
   0xb   :  { %s2961_s29 = smov 0   ;;  %s2963_s30 = smov 0  }
   0xc LB: > { %3512 = sst [smem:[#allocation5_spill]] %s2817_s3  ;;  %s2978_s4 = sadd.s32 4294967295, %s2829_s30   ;;  %s2829_s30 = sphi %s2963_s30, %s3537_s30   ;;  %s2825_s29 = sphi %s2961_s29, %s3539_s29   ;;  %s2821_s28 = sphi %s2959_s28, %s3541_s28   ;;  %s2817_s3 = sphi %s2957_s3, %s3540_s3  }
   0xd   : > { %3513 = sst [smem:[#allocation6_spill]] %s2825_s29  ;;  %s2375_s0 = sadd.s32 4294967294, %s2829_s30  }
   0xe   : > { %3514 = sst [smem:[#allocation7_spill]] %s2829_s30  ;;  %s2982_s23 = sadd.s32 1, %s2829_s30  }
   0xf   : > { %3515 = sst [smem:[#allocation8_spill]] %s2982_s23  ;;  %s529_s1 = sadd.s32 1, %s2825_s29 }
  0x10   : > { %s526_s5 = ssub.s32 %s2829_s30, %s2982_s23  ;;  %p539_p0 = scmp.ne.s32.totalorder %s2825_s29, %s2821_s28 }
  0x11   : > { %p527_p1 = scmp.eq.s32.totalorder %s526_s5, 0  ;;  %p540_p2 = scmp.eq.s32.totalorder %s2978_s4, 1 }
  0x12   : > { %p545_p3 = scmp.ne.s32.totalorder %s2821_s28, %s2817_s3  ;;  %p546_p4 = scmp.eq.s32.totalorder %s2375_s0, 1 }
  0x13   : > { %s2993_s24 = scalar_select %p527_p1, %s2825_s29, %s529_s1  }
  0x14   : > { %p2995_p5 = por %p540_p2, %p539_p0  ;;  %p2999_p6 = por %p546_p4, %p545_p3 }
  0x15   : > { %3516 = sst [smem:[#allocation9_spill]] %s2993_s24  ;;  %p2378_p7 = scmp.ge.s32.totalorder %s2829_s30, 1 }
  0x16   : > { %s3518_s25 = scalar_select %p2999_p6, 1, 0 }
  0x17   : > { %p653_p8 = scmp.lt.s32.totalorder %s2829_s30, 3 }
  0x18   : > { %3519 = sst [smem:[#allocation10_spill]] %s3518_s25 }
  0x19   : > { %p654_p9 = pnand %p2378_p7, %p653_p8 }
  0x1a   : > { %p732_p10 = scmp.lt.s32.totalorder (!%p654_p9), %s2978_s4, 1  ;;  %s3520_s1 = sld [smem:[#allocation11_spill]] (!%p654_p9) }
  0x1b   : > { %657 = sbr.rel (%p654_p9) target bundleno = 4933 (0x1345), region = 108  ;;  %s3521_s23 = sld [smem:[#allocation12_spill]] (!%p654_p9) }
  0x1c   : > { %s3522_s27 = sld [smem:[#allocation13_spill]] (!%p654_p9)  ;;  %s3502_s3 = smov (!%p654_p9), 104  }
  0x1d   : > { %s3523_s30 = sld [smem:[#allocation14_spill]] (!%p654_p9)  ;;  %s3500_s29 = smov (!%p654_p9), 96  }
  0x1e   : > { %s3527_s7 = sld [smem:[#allocation18_spill]] (!%p654_p9)  ;;  %s3496_s24 = smov (!%p654_p9), 8  }
  0x20   : > { %v2831_v0 = vmov 0   ;;  %s733_s26 = scalar_select %p732_p10, %s2978_s4, 1  ;;  %v2832_v3 = vmov 0.0   ;;  %vm793_vm5 = vcmask 130048   ;;  %vm883_vm14 = vcmask 261120  }
  0x21   : > { %2612 = vset.pattern.permute.xlu0 %v2831_v0  ;;  %2618 = vset.pattern.permute.xlu1 %v2831_v0 }
  0x22   : > { %2619 = vset.pattern.permute.xlu2 %v2831_v0  ;;  %s3007_s2 = sshll.u32 %s733_s26, 4  ;;  %s739_s25 = scalar_lea.vmem %s3521_s23, %s733_s26 }
  0x23   : > { %s736_s5 = scalar_lea.vmem %s3520_s1, %s3007_s2  ;;  %v764_v7 = vld [vmem:[%s739_s25] sm:$0x1]  ;;  %s744_s0 = scalar_lea.vmem %s3522_s27, %s3007_s2 }
  0x24   : > { %v756_v1 = vld [vmem:[%s736_s5] sm:$0xff]  ;;  %v757_v2 = vld [vmem:[%s736_s5 + $0x8] sm:$0xff]  ;;  %vm765_vm2 = vcmp.ge.s32.totalorder %v764_v7, 2  ;;  %s749_s23 = scalar_lea.vmem %s3523_s30, %s3007_s2  ;;  %s3524_s26 = sld [smem:[#allocation15_spill]] }
  0x25   : > { %vm758_vm0 = vcmp.eq.s32.totalorder %v756_v1, 0  ;;  %vm759_vm1 = vcmp.eq.s32.totalorder %v757_v2, 0  ;;  %v2389_v8 = vsel %vm765_vm2, 1.0, %v2832_v3  ;;  %v769_v9 = vld [vmem:[%s744_s0 + $0x8] sm:$0xff]  ;;  %v768_v10 = vld [vmem:[%s744_s0] sm:$0xff]  ;;  %s3525_s0 = sld [smem:[#allocation16_spill]] }
  0x26   : > { %v2387_v4 = vsel %vm758_vm0, 1.0, %v2832_v3  ;;  %v2388_v5 = vsel %vm759_vm1, 1.0, %v2832_v3  ;;  %v787_v11 = vperm.slane %v2389_v8, 0  ;;  %vm771_vm3 = vcmp.gt.f32.partialorder %v769_v9, 0.0  ;;  %v832_v24 = vld [vmem:[%s749_s23] sm:$0xff]  ;;  %v833_v25 = vld [vmem:[%s749_s23 + $0x8] sm:$0xff] }
  0x27   : > { %v2613_v6 = vpack.i.bf16 %v2388_v5, %v2387_v4  ;;  %vm770_vm4 = vcmp.gt.f32.partialorder %v768_v10, 0.0  ;;  %v3024_v15 = vsel %vm771_vm3, 1.0, %v2832_v3  ;;  %v853_v23 = vsub.f32 1.0, %v2387_v4  ;;  %s3526_s25 = sld [smem:[#allocation17_spill]]  ;;  %s3498_s30 = smov 64  }
  0x28   : > { %v3026_v16 = vsel %vm770_vm4, 1.0, %v2832_v3  ;;  %v835_v26 = vpack.c.bf16 %v833_v25, %v832_v24  ;;  %v854_v27 = vsub.f32 1.0, %v2388_v5  ;;  %v2833_v10 = vmov 32.0   ;;  %s3497_s23 = smov 16   ;;  %s730_s5 = sand.u32 1, %s2821_s28  }
  0x29   : > { %2614 = vperm.xlu0 %2612, %v2613_v6  }
  0x2a   : > { %846 = vmatpush.bf16.msra.mxu0 %v835_v26  ;;  %862 = vperm.xlu2 %2619, %v854_v27   ;;  %s754_s1 = scalar_lea.vmem %s3524_s26, %s3007_s2  ;;  %s2835_s2 = smov 120  }
  0x2b   : > { %v871_v59 = vld [vmem:[%s754_s1] sm:$0xff]  ;;  %v872_v5 = vld [vmem:[%s754_s1 + $0x8] sm:$0xff]  ;;  %s2271_s1 = scalar_lea.hbm %s3488_s22, %s2978_s4  ;;  %s2787_s4 = scalar_lea.hbm %s3488_s22, 2 }
  0x2c   : > { %v2650_v61 = vld [vmem:[%s3525_s0] ss:$0 sm:$0xff]  ;;  %s2834_s0 = smov 112  }
  0x84   : > { %v863_v62 = vpop.permute.xlu2 %862 }
  0x85   : > { %v866_v0 = vmul.f32 %v863_v62, %v833_v25 }
  0x9b   : > { %v3020_v12 = vpop.permute.xlu0 %2614 }
  0x9c   : > { %v2617_v13 = vunpack.i.h.bf16 %v3020_v12  ;;  %v2616_v14 = vunpack.i.l.bf16 %v3020_v12 }
  0x9e   : > { %v789_v17 = vmul.f32 %v2616_v14, %v787_v11  ;;  %v790_v18 = vmul.f32 %v2617_v13, %v787_v11 }
  0xa0   : > { %v792_v19 = vmul.f32 %v3024_v15, %v790_v18  ;;  %v791_v20 = vmul.f32 %v3026_v16, %v789_v17 }
  0xa2   : > { %v797_v21 = vsel %vm793_vm5, %v792_v19, 0.0  ;;  %v794_v22 = vsel %vm793_vm5, %v791_v20, 0.0 }
  0xa3   : > { %798 = vadd.xlane.f32.xlu1 %v797_v21  ;;  %795 = vadd.xlane.f32.xlu0 %v794_v22 }
  0xbc   : > { %857 = vperm.xlu1 %2618, %v853_v23  }
 0x116   : > { %v799_v28 = vpop.xlane.xlu1 %798  ;;  %v796_v29 = vpop.xlane.xlu0 %795 }
 0x117   : > { %v801_v30 = vadd.f32 1e-10, %v799_v28  ;;  %v800_v31 = vadd.f32 1e-10, %v796_v29  ;;  %v2541_v29 = vld [vmem:[%s3474_s8 + $0x8] sm:$0xff] }
 0x118   : > { %979 = vmatpush.bf16.msra.mxu1 %v2541_v29 }
 0x119   : > { %2669 = vrcp.f32 %v801_v30  ;;  %v828_v38 = vand.u32 2147483648, %v801_v30  ;;  %v813_v40 = vand.u32 2147483648, %v800_v31  ;;  %v826_v41 = vand.u32 2147483647, %v801_v30 }
 0x11a   : > { %2671 = vrcp.f32 %v800_v31  ;;  %v811_v43 = vand.u32 2147483647, %v800_v31  ;;  %vm822_vm8 = vweird.f32 %v801_v30  ;;  %vm807_vm9 = vweird.f32 %v800_v31 }
 0x11b   : > { %v829_v46 = vor.u32 1.1754944e-38, %v828_v38  ;;  %v814_v47 = vor.u32 1.1754944e-38, %v813_v40  ;;  %vm827_vm12 = vcmp.eq.f32.partialorder %v826_v41, 8.507059e+37  ;;  %2673 = vrcp.f32 %v2833_v10 }
 0x11c   : > { %vm812_vm13 = vcmp.eq.f32.partialorder %v811_v43, 8.507059e+37 }
 0x11f   : > { %v2670_v32 = vpop.eup %2669 }
 0x120   : > { %v2672_v33 = vpop.eup %2671  ;;  %v818_v34 = vmul.f32 %v2670_v32, %v801_v30  ;;  %vm823_vm6 = vweird.f32 %v2670_v32 }
 0x121   : > { %v803_v35 = vmul.f32 %v2672_v33, %v800_v31  ;;  %vm808_vm7 = vweird.f32 %v2672_v33  ;;  %vm824_vm10 = vmor %vm822_vm8, %vm823_vm6  ;;  %v2674_v11 = vpop.eup %2673  ;;  %v2540_v31 = vld [vmem:[%s3474_s8] sm:$0xff]  ;;  %vm1328_vm8 = vcmask 195584  }
 0x122   : > { %v819_v36 = vsub.f32 1.0, %v818_v34  ;;  %vm809_vm11 = vmor %vm807_vm9, %vm808_vm7  ;;  %vm895_vm15 = vweird.f32 %v2674_v11  ;;  %980 = vmatpush.bf16.msra.mxu1 %v2540_v31  ;;  %vm1008_vm7 = vcmask 64512  }
 0x123   : > { %v804_v37 = vsub.f32 1.0, %v803_v35 }
 0x124   : > { %v820_v39 = vmul.f32 %v2670_v32, %v819_v36 }
 0x125   : > { %v805_v42 = vmul.f32 %v2672_v33, %v804_v37 }
 0x126   : > { %v821_v44 = vadd.f32 %v2670_v32, %v820_v39 }
 0x127   : > { %v806_v45 = vadd.f32 %v2672_v33, %v805_v42 }
 0x128   : > { %v825_v48 = vsel %vm824_vm10, %v2670_v32, %v821_v44 }
 0x129   : > { %v810_v49 = vsel %vm809_vm11, %v2672_v33, %v806_v45  ;;  %v830_v50 = vsel %vm827_vm12, %v829_v46, %v825_v48 }
 0x12a   : > { %v815_v51 = vsel %vm812_vm13, %v814_v47, %v810_v49  ;;  %v831_v52 = vmul.f32 %v830_v50, %v792_v19  ;;  %v2651_v50 = vld [vmem:[%s3526_s25] ss:$0 sm:$0xff]  ;;  %s3495_s25 = smov 24  }
 0x12b   : > { %v816_v53 = vmul.f32 %v815_v51, %v791_v20 }
 0x12d   : > { %v834_v54 = vpack.c.bf16 %v831_v52, %v816_v53 }
 0x12e   : > { %v858_v55 = vpop.permute.xlu1 %857 }
 0x12f   : > { %2392 = vmatmul.msk.bf16.vlgmr.msra.gmra.mxu0 %vm793_vm5, %v834_v54  ;;  %v865_v56 = vmul.f32 %v858_v55, %v832_v24  ;;  %v2652_v55 = vld [vmem:[%s3527_s7] ss:$0 sm:$0xff] }
 0x1ac   : > { %v848_v57 = vpop.f32.mrf.mxu0 }
 0x1ad   : > { %v867_v58 = vmul.f32 %v2616_v14, %v848_v57  ;;  %v891_v14 = vmul.f32 32.0, %v2674_v11 }
 0x1af   : > { %v869_v60 = vadd.f32 %v867_v58, %v865_v56  ;;  %v892_v17 = vsub.f32 1.0, %v891_v14 }
 0x1b1   : > { %v873_v63 = vadd.f32 %v871_v59, %v869_v60  ;;  %v893_v18 = vmul.f32 %v2674_v11, %v892_v17  ;;  %v2653_v60 = vld [vmem:[%s3475_s9] ss:$0 sm:$0xff] }
 0x1b3   : > { %v879_v1 = vadd.f32 %v2650_v61, %v873_v63  ;;  %v894_v19 = vadd.f32 %v2674_v11, %v893_v18 }
 0x1b4   : > { %v850_v2 = vpop.f32.mrf.mxu0 }
 0x1b5   : > { %v868_v3 = vmul.f32 %v2617_v13, %v850_v2  ;;  %v884_v4 = vsel %vm883_vm14, %v879_v1, 0.0  ;;  %v3054_v12 = vsel %vm895_vm15, %v2674_v11, %v894_v19 }
 0x1b6   : > { %885 = vadd.xlane.f32.xlu2 %v884_v4 }
 0x1b7   : > { %v870_v6 = vadd.f32 %v868_v3, %v866_v0 }
 0x1b9   : > { %v874_v7 = vadd.f32 %v872_v5, %v870_v6 }
 0x1bb   : > { %v880_v8 = vadd.f32 %v2650_v61, %v874_v7 }
 0x1bd   : > { %v887_v9 = vsel %vm883_vm14, %v880_v8, 0.0 }
 0x1be   : > { %888 = vadd.xlane.f32.xlu1 %v887_v9 }
 0x229   : > { %v886_v13 = vpop.xlane.xlu2 %885 }
 0x22a   : > { %v897_v20 = vmul.f32 %v3054_v12, %v886_v13 }
 0x22c   : > { %v899_v21 = vsub.f32 %v879_v1, %v897_v20 }
 0x22e   : > { %v901_v22 = vmul.f32 %v899_v21, %v899_v21 }
 0x230   : > { %v903_v23 = vsel %vm883_vm14, %v901_v22, 0.0 }
 0x231   : > { %904 = vadd.xlane.f32.xlu2 %v903_v23  ;;  %v889_v24 = vpop.xlane.xlu1 %888 }
 0x232   : > { %v898_v25 = vmul.f32 %v3054_v12, %v889_v24 }
 0x234   : > { %v900_v26 = vsub.f32 %v880_v8, %v898_v25 }
 0x236   : > { %v902_v27 = vmul.f32 %v900_v26, %v900_v26 }
 0x238   : > { %v906_v28 = vsel %vm883_vm14, %v902_v27, 0.0 }
 0x239   : > { %907 = vadd.xlane.f32.xlu0 %v906_v28 }
 0x2a4   : > { %v905_v30 = vpop.xlane.xlu2 %904 }
 0x2a5   : > { %v909_v32 = vmul.f32 %v905_v30, %v3054_v12 }
 0x2a7   : > { %v911_v33 = vadd.f32 1e-05, %v909_v32  ;;  %v945_v32 = vsub.f32 1.0, %v3026_v16 }
 0x2a9   : > { %2675 = vrsqrt.f32 %v911_v33  ;;  %vm919_vm1 = vweird.f32 %v911_v33 }
 0x2ac   : > { %v908_v34 = vpop.xlane.xlu0 %907 }
 0x2ad   : > { %v910_v35 = vmul.f32 %v908_v34, %v3054_v12 }
 0x2af   : > { %v2676_v36 = vpop.eup %2675  ;;  %v912_v37 = vadd.f32 1e-05, %v910_v35 }
 0x2b0   : > { %v914_v38 = vmul.f32 %v2676_v36, %v911_v33  ;;  %vm920_vm0 = vweird.f32 %v2676_v36  ;;  %v3119_v33 = vmul.f32 -1e+09, %v945_v32 }
 0x2b1   : > { %2677 = vrsqrt.f32 %v912_v37  ;;  %vm921_vm2 = vmor %vm919_vm1, %vm920_vm0  ;;  %vm929_vm4 = vweird.f32 %v912_v37  ;;  %vm1520_vm0 = vcmask 523264  }
 0x2b2   : > { %v915_v39 = vmul.f32 %v2676_v36, %v914_v38 }
 0x2b4   : > { %v916_v40 = vmul.f32 0.5, %v915_v39 }
 0x2b6   : > { %v917_v41 = vsub.f32 1.5, %v916_v40 }
 0x2b7   : > { %v2678_v42 = vpop.eup %2677 }
 0x2b8   : > { %v918_v43 = vmul.f32 %v2676_v36, %v917_v41  ;;  %v924_v44 = vmul.f32 %v2678_v42, %v912_v37  ;;  %vm930_vm3 = vweird.f32 %v2678_v42 }
 0x2b9   : > { %vm931_vm6 = vmor %vm929_vm4, %vm930_vm3 }
 0x2ba   : > { %v925_v45 = vmul.f32 %v2678_v42, %v924_v44  ;;  %v922_v46 = vsel %vm921_vm2, %v2676_v36, %v918_v43  ;;  %v946_v36 = vsub.f32 1.0, %v3024_v15 }
 0x2bb   : > { %v933_v49 = vmul.f32 %v922_v46, %v899_v21 }
 0x2bc   : > { %v926_v47 = vmul.f32 0.5, %v925_v45  ;;  %v3124_v38 = vmul.f32 -1e+09, %v946_v36 }
 0x2bd   : > { %v938_v54 = vmul.f32 %v2651_v50, %v933_v49 }
 0x2be   : > { %v927_v48 = vsub.f32 1.5, %v926_v47 }
 0x2bf   : > { %v3074_v57 = vadd.f32 %v2652_v55, %v938_v54 }
 0x2c0   : > { %v928_v51 = vmul.f32 %v2678_v42, %v927_v48 }
 0x2c2   : > { %v932_v52 = vsel %vm931_vm6, %v2678_v42, %v928_v51 }
 0x2c3   : > { %v934_v53 = vmul.f32 %v932_v52, %v900_v26 }
 0x2c5   : > { %v939_v56 = vmul.f32 %v2651_v50, %v934_v53 }
 0x2c7   : > { %v3076_v58 = vadd.f32 %v2652_v55, %v939_v56 }
 0x2c9   : > { %v949_v59 = vpack.c.bf16 %v3076_v58, %v3074_v57 }
 0x2cb   : > { %2401 = vmatmul.msk.bf16.vlgmr.msra.gmra.mxu1 %vm883_vm14, %v949_v59 }
 0x348   : > { %v982_v61 = vpop.f32.mrf.mxu1 }
 0x349   : > { %v983_v62 = vadd.f32 %v2653_v60, %v982_v61 }
 0x34b   : > { %v987_v63 = vpack.c.bf16 %v983_v62, %v983_v62 }
 0x34d   : > { %995 = vrot.lane.b32.xlu1 %v987_v63, %s2834_s0  ;;  %991 = vrot.lane.b32.xlu2 %v987_v63, %s2835_s2  ;;  %v1003_v3 = vunpack.c.l.b16 %v987_v63 }
 0x350   : > { %v984_v0 = vpop.f32.mrf.mxu1 }
 0x351   : > { %v985_v1 = vadd.f32 %v2653_v60, %v984_v0 }
 0x353   : > { %v988_v2 = vpack.c.bf16 %v985_v1, %v985_v1 }
 0x355   : > { %993 = vrot.lane.b32.xlu0 %v988_v2, %s2835_s2  ;;  %999 = vrot.lane.b32.xlu2 %v987_v63, %s3502_s3  ;;  %v1004_v4 = vunpack.c.l.b16 %v988_v2 }
 0x357   : > { %v3088_v5 = vpack.c.b16 %v1004_v4, %v1003_v3 }
 0x359   : > { %1006 = vrot.lane.b32.xlu1 %v3088_v5, %s3500_s29 }
 0x35d   : > { %997 = vrot.lane.b32.xlu0 %v988_v2, %s2834_s0 }
 0x365   : > { %1001 = vrot.lane.b32.xlu0 %v988_v2, %s3502_s3  ;;  %s731_s3 = scalar_lea.vmem [#allocation2], %s730_s5 }
 0x3a7   : > { %v992_v7 = vpop.permute.xlu2 %991 }
 0x3a8   : > { %v1029_v9 = vunpack.c.l.b16 %v992_v7 }
 0x3af   : > { %v1000_v21 = vpop.permute.xlu2 %999 }
 0x3b0   : > { %v1079_v23 = vunpack.c.l.b16 %v1000_v21 }
 0x3bf   : > { %v996_v6 = vpop.permute.xlu1 %995 }
 0x3c0   : > { %v1054_v19 = vunpack.c.l.b16 %v996_v6 }
 0x3c7   : > { %v994_v8 = vpop.permute.xlu0 %993 }
 0x3c8   : > { %v1030_v10 = vunpack.c.l.b16 %v994_v8 }
 0x3ca   : > { %v3094_v11 = vpack.c.b16 %v1030_v10, %v1029_v9 }
 0x3cb   : > { %v1007_v14 = vpop.permute.xlu1 %1006 }
 0x3cc   : > { %1032 = vrot.lane.b32.xlu2 %v3094_v11, %s3500_s29  ;;  %v1013_v17 = vsel %vm1008_vm7, %v1007_v14, 0 }
 0x3cd   : > { %1022 = vmatpush.bf16.xpose.msra.mxu2 %v1013_v17 }
 0x3cf   : > { %v998_v18 = vpop.permute.xlu0 %997 }
 0x3d0   : > { %v1055_v13 = vunpack.c.l.b16 %v998_v18 }
 0x3d2   : > { %v3099_v20 = vpack.c.b16 %v1055_v13, %v1054_v19 }
 0x3d4   : > { %1057 = vrot.lane.b32.xlu0 %v3099_v20, %s3500_s29  ;;  %2402 = vmatmul.msk.bf16.vlgmr.msra.gmra.mxu2 %vm1008_vm7, %v3088_v5 }
 0x3d7   : > { %v1002_v22 = vpop.permute.xlu0 %1001 }
 0x3d8   : > { %v1080_v24 = vunpack.c.l.b16 %v1002_v22 }
 0x3da   : > { %v3105_v25 = vpack.c.b16 %v1080_v24, %v1079_v23 }
 0x3dc   : > { %1082 = vrot.lane.b32.xlu2 %v3105_v25, %s3500_s29  ;;  %s2273_s29 = sshll.u32 %s731_s3, 4  ;;  %s2274_s29 = int_to_ptr.vmem [resolvable:$true] %s2273_s29 }
 0x426   : > { %v1033_v26 = vpop.permute.xlu2 %1032 }
 0x427   : > { %v1038_v27 = vsel %vm1008_vm7, %v1033_v26, 0 }
 0x428   : > { %1047 = vmatpush.bf16.xpose.msra.mxu3 %v1038_v27 }
 0x42f   : > { %2403 = vmatmul.msk.bf16.vlgmr.msra.gmra.mxu3 %vm1008_vm7, %v3094_v11 }
 0x436   : > { %v1083_v28 = vpop.permute.xlu2 %1082 }
 0x437   : > { %v1088_v29 = vsel %vm1008_vm7, %v1083_v28, 0 }
 0x438   : > { %1097 = vmatpush.bf16.xpose.msrb.mxu1 %v1088_v29 }
 0x43f   : > { %2405 = vmatmul.msk.bf16.vlgmr.msrb.gmra.mxu1 %vm1008_vm7, %v3105_v25 }
 0x446   : > { %v1058_v30 = vpop.permute.xlu0 %1057 }
 0x447   : > { %v1063_v31 = vsel %vm1008_vm7, %v1058_v30, 0 }
 0x448   : > { %1072 = vmatpush.bf16.xpose.msrb.mxu0 %v1063_v31 }
 0x44f   : > { %2404 = vmatmul.msk.bf16.vlgmr.msrb.gmra.mxu0 %vm1008_vm7, %v3099_v20 }
 0x457   : > { %v1024_v41 = vpop.f32.mrf.mxu2 }
 0x458   : > { %v1025_v56 = vadd.f32 %v1024_v41, %v3119_v33 }
 0x45a   : > { %v1104_v59 = vsel %vm793_vm5, %v1025_v56, -inf }
 0x45f   : > { %v1026_v45 = vpop.f32.mrf.mxu2 }
 0x460   : > { %v3131_v15 = vadd.f32 %v1026_v45, %v3124_v38 }
 0x462   : > { %v1107_v48 = vsel %vm793_vm5, %v3131_v15, -inf }
 0x4b2   : > { %v1049_v34 = vpop.f32.mrf.mxu3 }
 0x4b3   : > { %v1050_v35 = vadd.f32 %v1049_v34, %v3119_v33 }
 0x4b5   : > { %v1110_v37 = vsel %vm793_vm5, %v1050_v35, -inf }
 0x4b6   : > { %1111 = vmax.xlane.f32.xlu0 %v1110_v37 }
 0x4ba   : > { %v1051_v39 = vpop.f32.mrf.mxu3 }
 0x4bb   : > { %v1052_v40 = vadd.f32 %v1051_v39, %v3124_v38 }
 0x4bc   : > { %v1099_v43 = vpop.f32.mrf.mxu1 }
 0x4bd   : > { %v1113_v42 = vsel %vm793_vm5, %v1052_v40, -inf  ;;  %v1100_v16 = vadd.f32 %v1099_v43, %v3119_v33 }
 0x4be   : > { %1114 = vmax.xlane.f32.xlu2 %v1113_v42 }
 0x4bf   : > { %v1122_v44 = vsel %vm793_vm5, %v1100_v16, -inf }
 0x4c4   : > { %v1101_v50 = vpop.f32.mrf.mxu1 }
 0x4c5   : > { %v1102_v51 = vadd.f32 %v1101_v50, %v3124_v38 }
 0x4c6   : > { %1123 = vmax.xlane.f32.xlu2 %v1122_v44 }
 0x4c7   : > { %v1125_v55 = vsel %vm793_vm5, %v1102_v51, -inf }
 0x4cc   : > { %v1074_v46 = vpop.f32.mrf.mxu0 }
 0x4cd   : > { %v1075_v47 = vadd.f32 %v1074_v46, %v3119_v33 }
 0x4ce   : > { %1108 = vmax.xlane.f32.xlu2 %v1107_v48 }
 0x4cf   : > { %v1116_v49 = vsel %vm793_vm5, %v1075_v47, -inf }
 0x4d0   : > { %1117 = vmax.xlane.f32.xlu1 %v1116_v49 }
 0x4d4   : > { %v1076_v52 = vpop.f32.mrf.mxu0 }
 0x4d5   : > { %v1077_v53 = vadd.f32 %v1076_v52, %v3124_v38 }
 0x4d7   : > { %v1119_v54 = vsel %vm793_vm5, %v1077_v53, -inf }
 0x4d8   : > { %1120 = vmax.xlane.f32.xlu0 %v1119_v54  ;;  %1126 = vmax.xlane.f32.xlu1 %v1125_v55 }
 0x4e0   : > { %1105 = vmax.xlane.f32.xlu0 %v1104_v59 }
 0x529   : > { %v1112_v60 = vpop.xlane.xlu0 %1111 }
 0x52a   : > { %v1130_v61 = vsub.f32 %v1050_v35, %v1112_v60 }
 0x52c   : > { %v1140_v62 = vmul.f32 1.442695, %v1130_v61 }
 0x52e   : > { %2679 = vpow2.f32 %v1140_v62 }
 0x531   : > { %v1115_v63 = vpop.xlane.xlu2 %1114 }
 0x532   : > { %v1131_v4 = vsub.f32 %v1052_v40, %v1115_v63 }
 0x534   : > { %v3143_v0 = vpop.eup %2679  ;;  %v1142_v7 = vmul.f32 1.442695, %v1131_v4 }
 0x535   : > { %v1158_v1 = vsel %vm793_vm5, %v3143_v0, 0.0 }
 0x536   : > { %1159 = vadd.xlane.f32.xlu1 %v1158_v1 }
 0x539   : > { %v1124_v2 = vpop.xlane.xlu2 %1123 }
 0x53a   : > { %v1134_v3 = vsub.f32 %v1100_v16, %v1124_v2 }
 0x53c   : > { %v1148_v6 = vmul.f32 1.442695, %v1134_v3 }
 0x53e   : > { %2681 = vpow2.f32 %v1148_v6 }
 0x53f   : > { %2683 = vpow2.f32 %v1142_v7 }
 0x541   : > { %v1109_v37 = vpop.xlane.xlu2 %1108 }
 0x542   : > { %v1129_v40 = vsub.f32 %v3131_v15, %v1109_v37 }
 0x543   : > { %v1118_v8 = vpop.xlane.xlu1 %1117 }
 0x544   : > { %v2682_v9 = vpop.eup %2681  ;;  %v1132_v10 = vsub.f32 %v1075_v47, %v1118_v8 }
 0x545   : > { %v1170_v14 = vsel %vm793_vm5, %v2682_v9, 0.0  ;;  %v3148_v18 = vpop.eup %2683 }
 0x546   : > { %v1144_v17 = vmul.f32 1.442695, %v1132_v10  ;;  %1171 = vadd.xlane.f32.xlu0 %v1170_v14  ;;  %v1161_v23 = vsel %vm793_vm5, %v3148_v18, 0.0 }
 0x548   : > { %2685 = vpow2.f32 %v1144_v17 }
 0x54b   : > { %v1121_v19 = vpop.xlane.xlu0 %1120  ;;  %v1127_v13 = vpop.xlane.xlu1 %1126 }
 0x54c   : > { %v1133_v21 = vsub.f32 %v1077_v53, %v1121_v19  ;;  %v1135_v22 = vsub.f32 %v1102_v51, %v1127_v13 }
 0x54e   : > { %v2686_v24 = vpop.eup %2685  ;;  %v1146_v26 = vmul.f32 1.442695, %v1133_v21  ;;  %v1150_v27 = vmul.f32 1.442695, %v1135_v22  ;;  %1162 = vadd.xlane.f32.xlu0 %v1161_v23 }
 0x54f   : > { %v1164_v28 = vsel %vm793_vm5, %v2686_v24, 0.0 }
 0x550   : > { %2687 = vpow2.f32 %v1146_v26  ;;  %1165 = vadd.xlane.f32.xlu2 %v1164_v28 }
 0x551   : > { %2689 = vpow2.f32 %v1150_v27 }
 0x553   : > { %v1106_v34 = vpop.xlane.xlu0 %1105 }
 0x554   : > { %v1128_v35 = vsub.f32 %v1025_v56, %v1106_v34 }
 0x556   : > { %v2688_v29 = vpop.eup %2687  ;;  %v1136_v36 = vmul.f32 1.442695, %v1128_v35 }
 0x557   : > { %v2690_v30 = vpop.eup %2689  ;;  %v1167_v31 = vsel %vm793_vm5, %v2688_v29, 0.0 }
 0x558   : > { %1168 = vadd.xlane.f32.xlu1 %v1167_v31  ;;  %v1173_v32 = vsel %vm793_vm5, %v2690_v30, 0.0  ;;  %2691 = vpow2.f32 %v1136_v36 }
 0x559   : > { %1174 = vadd.xlane.f32.xlu2 %v1173_v32 }
 0x55e   : > { %v3163_v39 = vpop.eup %2691 }
 0x562   : > { %1255 = vrot.lane.b32.xlu0 %v3099_v20, %s3498_s30  ;;  %v1152_v20 = vsel %vm793_vm5, %v3163_v39, 0.0 }
 0x571   : > { %1280 = vrot.lane.b32.xlu2 %v3105_v25, %s3498_s30  ;;  %1230 = vrot.lane.b32.xlu1 %v3094_v11, %s3498_s30  ;;  %v1138_v25 = vmul.f32 1.442695, %v1129_v40 }
 0x573   : > { %2693 = vpow2.f32 %v1138_v25 }
 0x579   : > { %1205 = vrot.lane.b32.xlu2 %v3088_v5, %s3498_s30  ;;  %v2694_v41 = vpop.eup %2693  ;;  %s3528_s30 = smov 104  }
 0x57a   : > { %v1155_v11 = vsel %vm793_vm5, %v2694_v41, 0.0 }
 0x58c   : > { %1153 = vadd.xlane.f32.xlu0 %v1152_v20 }
 0x59b   : > { %1156 = vadd.xlane.f32.xlu1 %v1155_v11  ;;  %v2542_v11 = vld [vmem:[%s3476_s10] sm:$0xff] }
 0x5a9   : > { %v1160_v5 = vpop.xlane.xlu1 %1159 }
 0x5b9   : > { %v1172_v42 = vpop.xlane.xlu0 %1171 }
 0x5c1   : > { %v1163_v45 = vpop.xlane.xlu0 %1162 }
 0x5c3   : > { %v1166_v43 = vpop.xlane.xlu2 %1165 }
 0x5c4   : > { %2695 = vrcp.f32 %v1166_v43 }
 0x5c5   : > { %2697 = vrcp.f32 %v1172_v42 }
 0x5ca   : > { %v2696_v44 = vpop.eup %2695 }
 0x5cb   : > { %v1169_v16 = vpop.xlane.xlu1 %1168  ;;  %v2698_v15 = vpop.eup %2697  ;;  %v1188_v47 = vmul.f32 %v2696_v44, %v2686_v24 }
 0x5cc   : > { %v1175_v46 = vpop.xlane.xlu2 %1174  ;;  %2699 = vrcp.f32 %v1169_v16  ;;  %v1190_v48 = vmul.f32 %v2698_v15, %v2682_v9 }
 0x5cd   : > { %2701 = vrcp.f32 %v1175_v46  ;;  %v1196_v51 = vpack.c.bf16 %v1188_v47, %v1188_v47 }
 0x5ce   : > { %2703 = vrcp.f32 %v1163_v45  ;;  %v1198_v53 = vpack.c.bf16 %v1190_v48, %v1190_v48 }
 0x5cf   : > { %2705 = vrcp.f32 %v1160_v5  ;;  %v1252_v62 = vunpack.c.l.b16 %v1196_v51 }
 0x5d0   : > { %v1277_v2 = vunpack.c.l.b16 %v1198_v53 }
 0x5d2   : > { %v2700_v49 = vpop.eup %2699 }
 0x5d3   : > { %v2702_v50 = vpop.eup %2701  ;;  %v1189_v52 = vmul.f32 %v2700_v49, %v2688_v29 }
 0x5d4   : > { %v1191_v54 = vmul.f32 %v2702_v50, %v2690_v30  ;;  %v1281_v55 = vpop.permute.xlu2 %1280  ;;  %v1256_v56 = vpop.permute.xlu0 %1255 }
 0x5d5   : > { %v1197_v59 = vpack.c.bf16 %v1189_v52, %v1189_v52  ;;  %1293 = vmatpush.bf16.msra.mxu1 %v1281_v55  ;;  %1268 = vmatpush.bf16.msra.mxu0 %v1256_v56  ;;  %v2704_v60 = vpop.eup %2703 }
 0x5d6   : > { %v1199_v61 = vpack.c.bf16 %v1191_v54, %v1191_v54  ;;  %v2706_v1 = vpop.eup %2705  ;;  %v1187_v4 = vmul.f32 %v2704_v60, %v3148_v18 }
 0x5d7   : > { %v1253_v63 = vunpack.c.l.b16 %v1197_v59  ;;  %v1186_v8 = vmul.f32 %v2706_v1, %v3143_v0  ;;  %v2654_v59 = vld [vmem:[%s3477_s11] ss:$0 sm:$0xff] }
 0x5d8   : > { %v1278_v3 = vunpack.c.l.b16 %v1199_v61  ;;  %v1195_v10 = vpack.c.bf16 %v1187_v4, %v1187_v4 }
 0x5d9   : > { %v1254_v6 = vpack.c.b16 %v1253_v63, %v1252_v62  ;;  %v1194_v14 = vpack.c.bf16 %v1186_v8, %v1186_v8 }
 0x5da   : > { %v1279_v7 = vpack.c.b16 %v1278_v3, %v1277_v2  ;;  %v1228_v17 = vunpack.c.l.b16 %v1195_v10 }
 0x5db   : > { %2408 = vmatmul.msk.bf16.vlgmr.msra.gmra.mxu0 %vm793_vm5, %v1254_v6  ;;  %v1227_v19 = vunpack.c.l.b16 %v1194_v14 }
 0x5dc   : > { %2409 = vmatmul.msk.bf16.vlgmr.msra.gmra.mxu1 %vm793_vm5, %v1279_v7  ;;  %v1206_v9 = vpop.permute.xlu2 %1205 }
 0x5dd   : > { %1218 = vmatpush.bf16.msrb.mxu2 %v1206_v9  ;;  %v1229_v21 = vpack.c.b16 %v1228_v17, %v1227_v19 }
 0x5e3   : > { %v1231_v13 = vpop.permute.xlu1 %1230 }
 0x5e4   : > { %1243 = vmatpush.bf16.msrb.mxu3 %v1231_v13 }
 0x5e7   : > { %2407 = vmatmul.msk.bf16.vlgmr.msrb.gmra.mxu3 %vm793_vm5, %v1229_v21 }
 0x5ff   : > { %v1154_v18 = vpop.xlane.xlu0 %1153 }
 0x600   : > { %2707 = vrcp.f32 %v1154_v18 }
 0x606   : > { %v2708_v23 = vpop.eup %2707 }
 0x607   : > { %v1184_v0 = vmul.f32 %v2708_v23, %v3163_v39  ;;  %v2544_v23 = vld [vmem:[%s3480_s14] sm:$0xff] }
 0x609   : > { %v1192_v26 = vpack.c.bf16 %v1184_v0, %v1184_v0 }
 0x60b   : > { %v1202_v29 = vunpack.c.l.b16 %v1192_v26 }
 0x60e   : > { %v1157_v22 = vpop.xlane.xlu1 %1156 }
 0x60f   : > { %2709 = vrcp.f32 %v1157_v22 }
 0x615   : > { %v2710_v24 = vpop.eup %2709 }
 0x616   : > { %v1185_v27 = vmul.f32 %v2710_v24, %v2694_v41  ;;  %v2543_v41 = vld [vmem:[%s3476_s10 + $0x8] sm:$0xff] }
 0x617   : > { %1361 = vmatpush.bf16.msra.mxu2 %v2543_v41 }
 0x618   : > { %v1193_v28 = vpack.c.bf16 %v1185_v27, %v1185_v27 }
 0x61a   : > { %v1203_v30 = vunpack.c.l.b16 %v1193_v28 }
 0x61b   : > { %1362 = vmatpush.bf16.msra.mxu2 %v2542_v11 }
 0x61c   : > { %v1204_v31 = vpack.c.b16 %v1203_v30, %v1202_v29 }
 0x61e   : > { %2406 = vmatmul.msk.bf16.vlgmr.msrb.gmra.mxu2 %vm793_vm5, %v1204_v31 }
 0x658   : > { %v1270_v32 = vpop.f32.mrf.mxu0 }
 0x659   : > { %v1295_v37 = vpop.f32.mrf.mxu1 }
 0x660   : > { %v1272_v34 = vpop.f32.mrf.mxu0 }
 0x661   : > { %v2620_v35 = vpack.i.bf16 %v1272_v34, %v1270_v32  ;;  %v1297_v39 = vpop.f32.mrf.mxu1 }
 0x662   : > { %v2630_v25 = vpack.i.bf16 %v1297_v39, %v1295_v37  ;;  %v2655_v39 = vld [vmem:[%s3478_s12] ss:$0 sm:$0xff] }
 0x663   : > { %2621 = vrot.lane.b32.xlu2 %v2620_v35, %s3497_s23  ;;  %s3529_s23 = smov 96  }
 0x66a   : > { %v1245_v36 = vpop.f32.mrf.mxu3 }
 0x672   : > { %v1247_v40 = vpop.f32.mrf.mxu3 }
 0x673   : > { %v2625_v20 = vpack.i.bf16 %v1247_v40, %v1245_v36 }
 0x675   : > { %2626 = vrot.lane.b32.xlu2 %v2625_v20, %s3496_s24  ;;  %s3532_s24 = smov 8  }
 0x67d   : > { %2631 = vrot.lane.b32.xlu2 %v2630_v25, %s3495_s25  ;;  %s3533_s25 = smov 24  }
 0x6a1   : > { %v1220_v5 = vpop.f32.mrf.mxu2 }
 0x6a9   : > { %v1222_v45 = vpop.f32.mrf.mxu2 }
 0x6bd   : > { %v2622_v42 = vpop.permute.xlu2 %2621 }
 0x6be   : > { %v2624_v47 = vunpack.i.h.bf16 %v2622_v42  ;;  %v2623_v48 = vunpack.i.l.bf16 %v2622_v42  ;;  %v2656_v42 = vld [vmem:[%s3479_s13] ss:$0 sm:$0xff] }
 0x6cf   : > { %v2627_v43 = vpop.permute.xlu2 %2626 }
 0x6d0   : > { %v2629_v16 = vunpack.i.h.bf16 %v2627_v43  ;;  %v2628_v44 = vunpack.i.l.bf16 %v2627_v43 }
 0x6d2   : > { %v1324_v46 = vsel %vm1008_vm7, %v1220_v5, %v2628_v44  ;;  %v1325_v15 = vsel %vm1008_vm7, %v1222_v45, %v2629_v16 }
 0x6d3   : > { %v1326_v52 = vsel %vm793_vm5, %v1324_v46, %v2623_v48  ;;  %v1327_v53 = vsel %vm793_vm5, %v1325_v15, %v2624_v47  ;;  %v2549_v15 = vld [vmem:[%s3482_s16 + $0x18] sm:$0xff]  ;;  %v2548_v47 = vld [vmem:[%s3482_s16 + $0x10] sm:$0xff]  ;;  %v2547_v48 = vld [vmem:[%s3482_s16 + $0x8] sm:$0xff] }
 0x6d4   : > { %1528 = vmatpush.bf16.msrb.mxu0 %v2549_v15 }
 0x6d7   : > { %v2632_v49 = vpop.permute.xlu2 %2631 }
 0x6d8   : > { %v2634_v50 = vunpack.i.h.bf16 %v2632_v49  ;;  %v2633_v51 = vunpack.i.l.bf16 %v2632_v49  ;;  %1529 = vmatpush.bf16.msrb.mxu0 %v2548_v47  ;;  %v2657_v49 = vld [vmem:[%s3481_s15] ss:$0 sm:$0xff] }
 0x6da   : > { %v1329_v54 = vsel %vm1328_vm8, %v1326_v52, %v2633_v51  ;;  %v1330_v55 = vsel %vm1328_vm8, %v1327_v53, %v2634_v50  ;;  %v2546_v51 = vld [vmem:[%s3482_s16] sm:$0xff] }
 0x6db   : > { %v1331_v56 = vpack.c.bf16 %v1330_v55, %v1329_v54 }
 0x6dc   : > { %1530 = vmatpush.bf16.msrb.mxu0 %v2547_v48 }
 0x6dd   : > { %2418 = vmatmul.msk.bf16.vlgmr.msra.gmra.mxu2 %vm883_vm14, %v1331_v56 }
 0x6e0   : > { %1531 = vmatpush.bf16.msrb.mxu0 %v2546_v51 }
 0x760   : > { %v1364_v60 = vpop.f32.mrf.mxu2 }
 0x761   : > { %v1365_v61 = vadd.f32 %v2654_v59, %v1364_v60 }
 0x763   : > { %v1369_v62 = vadd.f32 %v1365_v61, %v3074_v57 }
 0x765   : > { %v1373_v63 = vsel %vm883_vm14, %v1369_v62, 0.0 }
 0x766   : > { %1374 = vadd.xlane.f32.xlu2 %v1373_v63 }
 0x768   : > { %v1366_v1 = vpop.f32.mrf.mxu2 }
 0x769   : > { %v1367_v2 = vadd.f32 %v2654_v59, %v1366_v1 }
 0x76b   : > { %v1370_v3 = vadd.f32 %v1367_v2, %v3076_v58  ;;  %v2545_v58 = vld [vmem:[%s3480_s14 + $0x8] sm:$0xff] }
 0x76c   : > { %1457 = vmatpush.bf16.msra.mxu3 %v2545_v58 }
 0x76d   : > { %v1376_v4 = vsel %vm883_vm14, %v1370_v3, 0.0 }
 0x76e   : > { %1377 = vadd.xlane.f32.xlu0 %v1376_v4 }
 0x770   : > { %1458 = vmatpush.bf16.msra.mxu3 %v2544_v23 }
 0x7d9   : > { %v1375_v6 = vpop.xlane.xlu2 %1374 }
 0x7da   : > { %v1379_v7 = vmul.f32 %v1375_v6, %v3054_v12 }
 0x7dc   : > { %v1381_v8 = vsub.f32 %v1369_v62, %v1379_v7 }
 0x7de   : > { %v1383_v9 = vmul.f32 %v1381_v8, %v1381_v8 }
 0x7e0   : > { %v1385_v10 = vsel %vm883_vm14, %v1383_v9, 0.0 }
 0x7e1   : > { %v1378_v14 = vpop.xlane.xlu0 %1377  ;;  %1386 = vadd.xlane.f32.xlu1 %v1385_v10 }
 0x7e2   : > { %v1380_v57 = vmul.f32 %v1378_v14, %v3054_v12 }
 0x7e4   : > { %v1382_v17 = vsub.f32 %v1370_v3, %v1380_v57 }
 0x7e6   : > { %v1384_v19 = vmul.f32 %v1382_v17, %v1382_v17 }
 0x7e8   : > { %v1388_v13 = vsel %vm883_vm14, %v1384_v19, 0.0  ;;  %v2658_v19 = vld [vmem:[%s3483_s17] ss:$0 sm:$0xff] }
 0x7e9   : > { %1389 = vadd.xlane.f32.xlu0 %v1388_v13 }
 0x854   : > { %v1387_v21 = vpop.xlane.xlu1 %1386 }
 0x855   : > { %v1391_v18 = vmul.f32 %v1387_v21, %v3054_v12 }
 0x857   : > { %v1393_v22 = vadd.f32 1e-05, %v1391_v18 }
 0x859   : > { %2711 = vrsqrt.f32 %v1393_v22  ;;  %vm1401_vm10 = vweird.f32 %v1393_v22 }
 0x85c   : > { %v1390_v0 = vpop.xlane.xlu0 %1389 }
 0x85d   : > { %v1392_v24 = vmul.f32 %v1390_v0, %v3054_v12 }
 0x85f   : > { %v2712_v26 = vpop.eup %2711  ;;  %v1394_v27 = vadd.f32 1e-05, %v1392_v24 }
 0x860   : > { %v1396_v28 = vmul.f32 %v2712_v26, %v1393_v22  ;;  %vm1402_vm9 = vweird.f32 %v2712_v26 }
 0x861   : > { %2713 = vrsqrt.f32 %v1394_v27  ;;  %vm1403_vm11 = vmor %vm1401_vm10, %vm1402_vm9  ;;  %vm1411_vm13 = vweird.f32 %v1394_v27 }
 0x862   : > { %v1397_v29 = vmul.f32 %v2712_v26, %v1396_v28 }
 0x864   : > { %v1398_v30 = vmul.f32 0.5, %v1397_v29 }
 0x866   : > { %v1399_v31 = vsub.f32 1.5, %v1398_v30 }
 0x867   : > { %v2714_v32 = vpop.eup %2713 }
 0x868   : > { %v1400_v34 = vmul.f32 %v2712_v26, %v1399_v31  ;;  %v1406_v35 = vmul.f32 %v2714_v32, %v1394_v27  ;;  %vm1412_vm12 = vweird.f32 %v2714_v32 }
 0x869   : > { %vm1413_vm15 = vmor %vm1411_vm13, %vm1412_vm12 }
 0x86a   : > { %v1407_v36 = vmul.f32 %v2714_v32, %v1406_v35  ;;  %v1404_v37 = vsel %vm1403_vm11, %v2712_v26, %v1400_v34 }
 0x86b   : > { %v1415_v25 = vmul.f32 %v1404_v37, %v1381_v8  ;;  %v2551_v37 = vld [vmem:[%s3474_s8 + $0x18] sm:$0xff] }
 0x86c   : > { %v1408_v40 = vmul.f32 0.5, %v1407_v36  ;;  %1628 = vmatpush.bf16.msrb.mxu1 %v2551_v37 }
 0x86d   : > { %v1420_v5 = vmul.f32 %v2655_v39, %v1415_v25  ;;  %v2550_v25 = vld [vmem:[%s3474_s8 + $0x10] sm:$0xff] }
 0x86e   : > { %v1409_v20 = vsub.f32 1.5, %v1408_v40 }
 0x86f   : > { %v1425_v44 = vadd.f32 %v2656_v42, %v1420_v5 }
 0x870   : > { %v1410_v41 = vmul.f32 %v2714_v32, %v1409_v20  ;;  %1629 = vmatpush.bf16.msrb.mxu1 %v2550_v25 }
 0x872   : > { %v1414_v11 = vsel %vm1413_vm15, %v2714_v32, %v1410_v41 }
 0x873   : > { %v1416_v43 = vmul.f32 %v1414_v11, %v1382_v17 }
 0x875   : > { %v1421_v16 = vmul.f32 %v2655_v39, %v1416_v43 }
 0x877   : > { %v1426_v45 = vadd.f32 %v2656_v42, %v1421_v16 }
 0x879   : > { %v1427_v46 = vpack.c.bf16 %v1426_v45, %v1425_v44 }
 0x87b   : > { %2427 = vmatmul.msk.bf16.vlgmr.msra.gmra.mxu3 %vm883_vm14, %v1427_v46 }
 0x8fe   : > { %v1460_v50 = vpop.f32.mrf.mxu3 }
 0x8ff   : > { %v1461_v52 = vadd.f32 %v2657_v49, %v1460_v50 }
 0x901   : > { %v1465_v53 = vmul.f32 %v1461_v52, %v1461_v52 }
 0x903   : > { %v1467_v54 = vmul.f32 %v1465_v53, %v1461_v52 }
 0x905   : > { %v1469_v55 = vmul.f32 0.044715, %v1467_v54 }
 0x906   : > { %v1462_v56 = vpop.f32.mrf.mxu3 }
 0x907   : > { %v1471_v59 = vadd.f32 %v1469_v55, %v1461_v52  ;;  %v1463_v60 = vadd.f32 %v2657_v49, %v1462_v56  ;;  %v2660_v56 = vld [vmem:[%s3485_s19] ss:$0 sm:$0xff] }
 0x909   : > { %v1473_v61 = vmul.f32 0.7978846, %v1471_v59  ;;  %v1466_v62 = vmul.f32 %v1463_v60, %v1463_v60 }
 0x90b   : > { %v1468_v63 = vmul.f32 %v1466_v62, %v1463_v60  ;;  %2715 = vtanh.f32 %v1473_v61 }
 0x90d   : > { %v1470_v1 = vmul.f32 0.044715, %v1468_v63 }
 0x90f   : > { %v1472_v2 = vadd.f32 %v1470_v1, %v1463_v60 }
 0x911   : > { %v1474_v3 = vmul.f32 0.7978846, %v1472_v2  ;;  %v2716_v4 = vpop.eup %2715  ;;  %v2661_v2 = vld [vmem:[%s3475_s9 + $0x1] ss:$0 sm:$0xff] }
 0x912   : > { %v1477_v6 = vadd.f32 1.0, %v2716_v4 }
 0x913   : > { %2717 = vtanh.f32 %v1474_v3 }
 0x914   : > { %v1479_v8 = vmul.f32 0.5, %v1477_v6 }
 0x916   : > { %v1481_v14 = vmul.f32 %v1479_v8, %v1461_v52  ;;  %v2659_v52 = vld [vmem:[%s3484_s18] ss:$0 sm:$0xff] }
 0x919   : > { %v2718_v7 = vpop.eup %2717 }
 0x91a   : > { %v1478_v9 = vadd.f32 1.0, %v2718_v7 }
 0x91c   : > { %v1480_v10 = vmul.f32 0.5, %v1478_v9 }
 0x91e   : > { %v1482_v57 = vmul.f32 %v1480_v10, %v1463_v60 }
 0x920   : > { %v1483_v17 = vpack.c.bf16 %v1482_v57, %v1481_v14 }
 0x922   : > { %2444 = vmatmul.msk.bf16.vlgmr.msrb.gmra.mxu0 %vm1520_vm0, %v1483_v17 }
 0x99f   : > { %v1533_v13 = vpop.f32.mrf.mxu0 }
 0x9a0   : > { %v1534_v58 = vadd.f32 %v2658_v19, %v1533_v13 }
 0x9a2   : > { %v1538_v21 = vadd.f32 %v1534_v58, %v1425_v44 }
 0x9a4   : > { %v1542_v18 = vsel %vm883_vm14, %v1538_v21, 0.0 }
 0x9a5   : > { %1543 = vadd.xlane.f32.xlu1 %v1542_v18 }
 0x9a7   : > { %v1535_v22 = vpop.f32.mrf.mxu0 }
 0x9a8   : > { %v1536_v23 = vadd.f32 %v2658_v19, %v1535_v22 }
 0x9aa   : > { %v1539_v0 = vadd.f32 %v1536_v23, %v1426_v45 }
 0x9ac   : > { %v1545_v24 = vsel %vm883_vm14, %v1539_v0, 0.0 }
 0x9ad   : > { %1546 = vadd.xlane.f32.xlu0 %v1545_v24 }
 0xa18   : > { %v1544_v26 = vpop.xlane.xlu1 %1543 }
 0xa19   : > { %v1548_v27 = vmul.f32 %v1544_v26, %v3054_v12 }
 0xa1b   : > { %v1550_v28 = vsub.f32 %v1538_v21, %v1548_v27 }
 0xa1d   : > { %v1552_v29 = vmul.f32 %v1550_v28, %v1550_v28 }
 0xa1f   : > { %v1554_v30 = vsel %vm883_vm14, %v1552_v29, 0.0 }
 0xa20   : > { %v1547_v31 = vpop.xlane.xlu0 %1546  ;;  %1555 = vadd.xlane.f32.xlu1 %v1554_v30 }
 0xa21   : > { %v1549_v32 = vmul.f32 %v1547_v31, %v3054_v12 }
 0xa23   : > { %v1551_v34 = vsub.f32 %v1539_v0, %v1549_v32 }
 0xa25   : > { %v1553_v35 = vmul.f32 %v1551_v34, %v1551_v34 }
 0xa27   : > { %v1557_v36 = vsel %vm883_vm14, %v1553_v35, 0.0 }
 0xa28   : > { %1558 = vadd.xlane.f32.xlu0 %v1557_v36 }
 0xa93   : > { %v1556_v40 = vpop.xlane.xlu1 %1555 }
 0xa94   : > { %v1560_v20 = vmul.f32 %v1556_v40, %v3054_v12 }
 0xa96   : > { %v1562_v39 = vadd.f32 1e-05, %v1560_v20 }
 0xa98   : > { %2719 = vrsqrt.f32 %v1562_v39  ;;  %vm1570_vm2 = vweird.f32 %v1562_v39 }
 0xa9b   : > { %v1559_v41 = vpop.xlane.xlu0 %1558 }
 0xa9c   : > { %v1561_v11 = vmul.f32 %v1559_v41, %v3054_v12 }
 0xa9e   : > { %v2720_v42 = vpop.eup %2719  ;;  %v1563_v5 = vadd.f32 1e-05, %v1561_v11 }
 0xa9f   : > { %v1565_v43 = vmul.f32 %v2720_v42, %v1562_v39  ;;  %vm1571_vm1 = vweird.f32 %v2720_v42 }
 0xaa0   : > { %2721 = vrsqrt.f32 %v1563_v5  ;;  %vm1572_vm3 = vmor %vm1570_vm2, %vm1571_vm1  ;;  %vm1580_vm6 = vweird.f32 %v1563_v5 }
 0xaa1   : > { %v1566_v16 = vmul.f32 %v2720_v42, %v1565_v43 }
 0xaa3   : > { %v1567_v44 = vmul.f32 0.5, %v1566_v16 }
 0xaa5   : > { %v1568_v45 = vsub.f32 1.5, %v1567_v44 }
 0xaa6   : > { %v2722_v46 = vpop.eup %2721 }
 0xaa7   : > { %v1569_v15 = vmul.f32 %v2720_v42, %v1568_v45  ;;  %v1575_v47 = vmul.f32 %v2722_v46, %v1563_v5  ;;  %vm1581_vm4 = vweird.f32 %v2722_v46 }
 0xaa8   : > { %vm1582_vm9 = vmor %vm1580_vm6, %vm1581_vm4 }
 0xaa9   : > { %v1576_v48 = vmul.f32 %v2722_v46, %v1575_v47  ;;  %v1573_v49 = vsel %vm1572_vm3, %v2720_v42, %v1569_v15 }
 0xaaa   : > { %v1584_v53 = vmul.f32 %v1573_v49, %v1550_v28 }
 0xaab   : > { %v1577_v50 = vmul.f32 0.5, %v1576_v48 }
 0xaac   : > { %v1589_v59 = vmul.f32 %v2659_v52, %v1584_v53 }
 0xaad   : > { %v1578_v51 = vsub.f32 1.5, %v1577_v50 }
 0xaae   : > { %v3257_v62 = vadd.f32 %v2660_v56, %v1589_v59 }
 0xaaf   : > { %v1579_v54 = vmul.f32 %v2722_v46, %v1578_v51 }
 0xab1   : > { %v1583_v55 = vsel %vm1582_vm9, %v2722_v46, %v1579_v54 }
 0xab2   : > { %v1585_v60 = vmul.f32 %v1583_v55, %v1551_v34 }
 0xab4   : > { %v1590_v61 = vmul.f32 %v2659_v52, %v1585_v60 }
 0xab6   : > { %v3259_v63 = vadd.f32 %v2660_v56, %v1590_v61 }
 0xab8   : > { %v1596_v1 = vpack.c.bf16 %v3259_v63, %v3257_v62 }
 0xaba   : > { %2458 = vmatmul.msk.bf16.vlgmr.msrb.gmra.mxu1 %vm883_vm14, %v1596_v1 }
 0xb37   : > { %v1631_v3 = vpop.f32.mrf.mxu1 }
 0xb38   : > { %v1632_v4 = vadd.f32 %v2661_v2, %v1631_v3 }
 0xb3a   : > { %v1636_v6 = vpack.c.bf16 %v1632_v4, %v1632_v4 }
 0xb3c   : > { %1644 = vrot.lane.b32.xlu2 %v1636_v6, %s2834_s0  ;;  %1640 = vrot.lane.b32.xlu1 %v1636_v6, %s2835_s2  ;;  %v1652_v10 = vunpack.c.l.b16 %v1636_v6 }
 0xb3f   : > { %v1633_v7 = vpop.f32.mrf.mxu1 }
 0xb40   : > { %v1634_v8 = vadd.f32 %v2661_v2, %v1633_v7 }
 0xb42   : > { %v1637_v9 = vpack.c.bf16 %v1634_v8, %v1634_v8 }
 0xb44   : > { %1642 = vrot.lane.b32.xlu0 %v1637_v9, %s2835_s2  ;;  %1648 = vrot.lane.b32.xlu1 %v1636_v6, %s3528_s30  ;;  %v1653_v14 = vunpack.c.l.b16 %v1637_v9  ;;  %s3531_s2 = smov 16  }
 0xb46   : > { %v3271_v57 = vpack.c.b16 %v1653_v14, %v1652_v10 }
 0xb4c   : > { %1646 = vrot.lane.b32.xlu0 %v1637_v9, %s2834_s0  ;;  %s3530_s0 = smov 64  }
 0xb54   : > { %1650 = vrot.lane.b32.xlu0 %v1637_v9, %s3528_s30  ;;  %s2275_s30 = sshll.u32 %s2271_s1, 4  ;;  %s2276_s30 = int_to_ptr.hbm [resolvable:$true] %s2275_s30 }
 0xb96   : > { %v1645_v18 = vpop.permute.xlu2 %1644 }
 0xb97   : > { %v1702_v23 = vunpack.c.l.b16 %v1645_v18 }
 0xbae   : > { %v1641_v17 = vpop.permute.xlu1 %1640 }
 0xbaf   : > { %v1677_v13 = vunpack.c.l.b16 %v1641_v17 }
 0xbb6   : > { %v1643_v19 = vpop.permute.xlu0 %1642  ;;  %v1649_v26 = vpop.permute.xlu1 %1648 }
 0xbb7   : > { %v1678_v58 = vunpack.c.l.b16 %v1643_v19  ;;  %v1727_v28 = vunpack.c.l.b16 %v1649_v26 }
 0xbb9   : > { %v3275_v21 = vpack.c.b16 %v1678_v58, %v1677_v13 }
 0xbbb   : > { %1680 = vrot.lane.b32.xlu1 %v3275_v21, %s3529_s23 }
 0xbbe   : > { %v1647_v22 = vpop.permute.xlu0 %1646 }
 0xbbf   : > { %v1703_v0 = vunpack.c.l.b16 %v1647_v22 }
 0xbc1   : > { %v3279_v24 = vpack.c.b16 %v1703_v0, %v1702_v23 }
 0xbc3   : > { %1705 = vrot.lane.b32.xlu2 %v3279_v24, %s3529_s23  ;;  %1655 = vrot.lane.b32.xlu1 %v3271_v57, %s3529_s23 }
 0xbc6   : > { %v1651_v27 = vpop.permute.xlu0 %1650 }
 0xbc7   : > { %v1728_v29 = vunpack.c.l.b16 %v1651_v27 }
 0xbc9   : > { %v3285_v30 = vpack.c.b16 %v1728_v29, %v1727_v28 }
 0xbcb   : > { %1730 = vrot.lane.b32.xlu0 %v3285_v30, %s3529_s23  ;;  %s2263_s23 = scalar_lea.sflag [#allocation3], %s730_s5 }
 0xc1d   : > { %v1706_v31 = vpop.permute.xlu2 %1705 }
 0xc1e   : > { %v1711_v32 = vsel %vm1008_vm7, %v1706_v31, 0 }
 0xc1f   : > { %1720 = vmatpush.bf16.xpose.msra.mxu0 %v1711_v32 }
 0xc26   : > { %2461 = vmatmul.msk.bf16.vlgmr.msra.gmra.mxu0 %vm1008_vm7, %v3279_v24 }
 0xc2d   : > { %v1681_v34 = vpop.permute.xlu1 %1680 }
 0xc2e   : > { %v1686_v35 = vsel %vm1008_vm7, %v1681_v34, 0 }
 0xc2f   : > { %1695 = vmatpush.bf16.xpose.msrb.mxu3 %v1686_v35 }
 0xc35   : > { %v1656_v36 = vpop.permute.xlu1 %1655 }
 0xc36   : > { %v1661_v37 = vsel %vm1008_vm7, %v1656_v36, 0  ;;  %2460 = vmatmul.msk.bf16.vlgmr.msrb.gmra.mxu3 %vm1008_vm7, %v3275_v21 }
 0xc37   : > { %1670 = vmatpush.bf16.xpose.msrb.mxu2 %v1661_v37 }
 0xc3d   : > { %v1731_v40 = vpop.permute.xlu0 %1730 }
 0xc3e   : > { %v1736_v20 = vsel %vm1008_vm7, %v1731_v40, 0  ;;  %2459 = vmatmul.msk.bf16.vlgmr.msrb.gmra.mxu2 %vm1008_vm7, %v3271_v57 }
 0xc3f   : > { %1745 = vmatpush.bf16.xpose.msra.mxu1 %v1736_v20 }
 0xc46   : > { %2462 = vmatmul.msk.bf16.vlgmr.msra.gmra.mxu1 %vm1008_vm7, %v3285_v30 }
 0xca3   : > { %v1722_v39 = vpop.f32.mrf.mxu0 }
 0xca4   : > { %v1723_v25 = vadd.f32 %v1722_v39, %v3119_v33 }
 0xca6   : > { %v1764_v41 = vsel %vm793_vm5, %v1723_v25, -inf }
 0xca7   : > { %1765 = vmax.xlane.f32.xlu1 %v1764_v41 }
 0xcab   : > { %v1724_v43 = vpop.f32.mrf.mxu0 }
 0xcac   : > { %v1725_v16 = vadd.f32 %v1724_v43, %v3124_v38 }
 0xcae   : > { %v1767_v48 = vsel %vm793_vm5, %v1725_v16, -inf }
 0xcb9   : > { %v1697_v11 = vpop.f32.mrf.mxu3 }
 0xcba   : > { %v1698_v42 = vadd.f32 %v1697_v11, %v3119_v33 }
 0xcbc   : > { %v1758_v5 = vsel %vm793_vm5, %v1698_v42, -inf }
 0xcbd   : > { %1759 = vmax.xlane.f32.xlu2 %v1758_v5 }
 0xcc1   : > { %v1699_v44 = vpop.f32.mrf.mxu3  ;;  %v1672_v46 = vpop.f32.mrf.mxu2 }
 0xcc2   : > { %v1700_v45 = vadd.f32 %v1699_v44, %v3124_v38  ;;  %v3310_v49 = vadd.f32 %v1672_v46, %v3119_v33 }
 0xcc3   : > { %v1747_v15 = vpop.f32.mrf.mxu1 }
 0xcc4   : > { %v1761_v47 = vsel %vm793_vm5, %v1700_v45, -inf  ;;  %v1748_v50 = vadd.f32 %v1747_v15, %v3119_v33  ;;  %v1752_v54 = vsel %vm793_vm5, %v3310_v49, -inf }
 0xcc5   : > { %1762 = vmax.xlane.f32.xlu0 %v1761_v47  ;;  %1768 = vmax.xlane.f32.xlu2 %v1767_v48 }
 0xcc6   : > { %v1770_v53 = vsel %vm793_vm5, %v1748_v50, -inf }
 0xcc9   : > { %v1674_v55 = vpop.f32.mrf.mxu2 }
 0xcca   : > { %v1675_v59 = vadd.f32 %v1674_v55, %v3124_v38 }
 0xccb   : > { %v1749_v51 = vpop.f32.mrf.mxu1 }
 0xccc   : > { %v1750_v52 = vadd.f32 %v1749_v51, %v3124_v38  ;;  %v1755_v60 = vsel %vm793_vm5, %v1675_v59, -inf }
 0xccd   : > { %1771 = vmax.xlane.f32.xlu0 %v1770_v53  ;;  %1753 = vmax.xlane.f32.xlu2 %v1752_v54 }
 0xcce   : > { %v1773_v56 = vsel %vm793_vm5, %v1750_v52, -inf }
 0xccf   : > { %1774 = vmax.xlane.f32.xlu1 %v1773_v56 }
 0xcd5   : > { %1756 = vmax.xlane.f32.xlu0 %v1755_v60 }
 0xd1a   : > { %v1766_v33 = vpop.xlane.xlu1 %1765 }
 0xd1b   : > { %v1780_v61 = vsub.f32 %v1723_v25, %v1766_v33 }
 0xd1d   : > { %v1792_v1 = vmul.f32 1.442695, %v1780_v61 }
 0xd1f   : > { %2723 = vpow2.f32 %v1792_v1 }
 0xd25   : > { %v3320_v2 = vpop.eup %2723 }
 0xd26   : > { %v1812_v3 = vsel %vm793_vm5, %v3320_v2, 0.0 }
 0xd27   : > { %1813 = vadd.xlane.f32.xlu0 %v1812_v3 }
 0xd30   : > { %v1760_v4 = vpop.xlane.xlu2 %1759 }
 0xd31   : > { %v1778_v6 = vsub.f32 %v1698_v42, %v1760_v4 }
 0xd33   : > { %v1788_v7 = vmul.f32 1.442695, %v1778_v6 }
 0xd35   : > { %2725 = vpow2.f32 %v1788_v7 }
 0xd38   : > { %v1763_v8 = vpop.xlane.xlu0 %1762  ;;  %v1769_v9 = vpop.xlane.xlu2 %1768 }
 0xd39   : > { %v1781_v38 = vsub.f32 %v1725_v16, %v1769_v9  ;;  %v1779_v18 = vsub.f32 %v1700_v45, %v1763_v8 }
 0xd3b   : > { %v3324_v10 = vpop.eup %2725  ;;  %v1794_v14 = vmul.f32 1.442695, %v1781_v38  ;;  %v1790_v28 = vmul.f32 1.442695, %v1779_v18 }
 0xd3c   : > { %v1806_v17 = vsel %vm793_vm5, %v3324_v10, 0.0 }
 0xd3d   : > { %1807 = vadd.xlane.f32.xlu1 %v1806_v17  ;;  %2727 = vpow2.f32 %v1794_v14 }
 0xd40   : > { %v1772_v19 = vpop.xlane.xlu0 %1771  ;;  %v1754_v39 = vpop.xlane.xlu2 %1753 }
 0xd41   : > { %v1782_v13 = vsub.f32 %v1748_v50, %v1772_v19  ;;  %v1776_v25 = vsub.f32 %v3310_v49, %v1754_v39 }
 0xd42   : > { %v1775_v58 = vpop.xlane.xlu1 %1774 }
 0xd43   : > { %v1796_v22 = vmul.f32 1.442695, %v1782_v13  ;;  %v1783_v23 = vsub.f32 %v1750_v52, %v1775_v58  ;;  %v2728_v0 = vpop.eup %2727  ;;  %v1784_v11 = vmul.f32 1.442695, %v1776_v25 }
 0xd44   : > { %v1815_v27 = vsel %vm793_vm5, %v2728_v0, 0.0 }
 0xd45   : > { %2729 = vpow2.f32 %v1796_v22  ;;  %v1798_v26 = vmul.f32 1.442695, %v1783_v23  ;;  %1816 = vadd.xlane.f32.xlu1 %v1815_v27 }
 0xd47   : > { %2731 = vpow2.f32 %v1798_v26 }
 0xd48   : > { %2733 = vpow2.f32 %v1790_v28  ;;  %v1757_v37 = vpop.xlane.xlu0 %1756 }
 0xd49   : > { %v1777_v40 = vsub.f32 %v1675_v59, %v1757_v37 }
 0xd4b   : > { %v2730_v29 = vpop.eup %2729  ;;  %v1786_v20 = vmul.f32 1.442695, %v1777_v40 }
 0xd4c   : > { %v1818_v31 = vsel %vm793_vm5, %v2730_v29, 0.0 }
 0xd4d   : > { %v2732_v32 = vpop.eup %2731  ;;  %1819 = vadd.xlane.f32.xlu2 %v1818_v31  ;;  %2735 = vpow2.f32 %v1786_v20 }
 0xd4e   : > { %v1821_v34 = vsel %vm793_vm5, %v2732_v32, 0.0  ;;  %v2734_v35 = vpop.eup %2733  ;;  %2737 = vpow2.f32 %v1784_v11  ;;  %v2553_v11 = vld [vmem:[%s3476_s10 + $0x18] sm:$0xff] }
 0xd4f   : > { %1822 = vadd.xlane.f32.xlu0 %v1821_v34  ;;  %v1809_v36 = vsel %vm793_vm5, %v2734_v35, 0.0 }
 0xd53   : > { %v3341_v41 = vpop.eup %2735 }
 0xd55   : > { %1810 = vadd.xlane.f32.xlu2 %v1809_v36 }
 0xd5e   : > { %1878 = vrot.lane.b32.xlu1 %v3275_v21, %s3530_s0  ;;  %v1803_v21 = vsel %vm793_vm5, %v3341_v41, 0.0 }
 0xd63   : > { %1928 = vrot.lane.b32.xlu0 %v3285_v30, %s3530_s0  ;;  %v2738_v30 = vpop.eup %2737 }
 0xd6b   : > { %1853 = vrot.lane.b32.xlu0 %v3271_v57, %s3530_s0  ;;  %v1800_v57 = vsel %vm793_vm5, %v2738_v30, 0.0 }
 0xd6d   : > { %1903 = vrot.lane.b32.xlu2 %v3279_v24, %s3530_s0  ;;  %s2781_s0 = sshra.s32 %s2276_s30, 4  ;;  %s2782_s0 = int_to_ptr.hbm [resolvable:$true] %s2781_s0 }
 0xd6e   : > { %p2788_p0 = scmp.lt.s32.totalorder %s2782_s0, %s3488_s22 }
 0xd88   : > { %1804 = vadd.xlane.f32.xlu1 %v1803_v21  ;;  %v2552_v21 = vld [vmem:[%s3476_s10 + $0x10] sm:$0xff] }
 0xd96   : > { %1801 = vadd.xlane.f32.xlu2 %v1800_v57 }
 0xd9a   : > { %v1814_v42 = vpop.xlane.xlu0 %1813 }
 0xdb0   : > { %v1808_v24 = vpop.xlane.xlu1 %1807 }
 0xdb8   : > { %v1817_v5 = vpop.xlane.xlu1 %1816 }
 0xdb9   : > { %2739 = vrcp.f32 %v1817_v5 }
 0xdba   : > { %2741 = vrcp.f32 %v1814_v42 }
 0xdbb   : > { %2743 = vrcp.f32 %v1808_v24 }
 0xdbf   : > { %v2740_v44 = vpop.eup %2739 }
 0xdc0   : > { %v1820_v43 = vpop.xlane.xlu2 %1819  ;;  %v2742_v45 = vpop.eup %2741  ;;  %v1837_v46 = vmul.f32 %v2740_v44, %v2728_v0 }
 0xdc1   : > { %v2744_v15 = vpop.eup %2743  ;;  %v1836_v47 = vmul.f32 %v2742_v45, %v3320_v2 }
 0xdc2   : > { %v1823_v16 = vpop.xlane.xlu0 %1822  ;;  %v1845_v51 = vpack.c.bf16 %v1837_v46, %v1837_v46  ;;  %v1834_v54 = vmul.f32 %v2744_v15, %v3324_v10 }
 0xdc3   : > { %2745 = vrcp.f32 %v1823_v16  ;;  %v1844_v53 = vpack.c.bf16 %v1836_v47, %v1836_v47 }
 0xdc4   : > { %2747 = vrcp.f32 %v1820_v43  ;;  %v1901_v56 = vunpack.c.l.b16 %v1845_v51  ;;  %v1842_v61 = vpack.c.bf16 %v1834_v54, %v1834_v54  ;;  %v2662_v54 = vld [vmem:[%s3477_s11 + $0x1] ss:$0 sm:$0xff] }
 0xdc5   : > { %v1900_v33 = vunpack.c.l.b16 %v1844_v53 }
 0xdc6   : > { %v1875_v9 = vunpack.c.l.b16 %v1842_v61 }
 0xdc7   : > { %v1902_v2 = vpack.c.b16 %v1901_v56, %v1900_v33 }
 0xdc8   : > { %v1811_v48 = vpop.xlane.xlu2 %1810 }
 0xdc9   : > { %v2746_v49 = vpop.eup %2745  ;;  %2749 = vrcp.f32 %v1811_v48 }
 0xdca   : > { %v2748_v50 = vpop.eup %2747  ;;  %v1839_v52 = vmul.f32 %v2746_v49, %v2732_v32 }
 0xdcb   : > { %v1838_v55 = vmul.f32 %v2748_v50, %v2730_v29 }
 0xdcc   : > { %v1847_v60 = vpack.c.bf16 %v1839_v52, %v1839_v52 }
 0xdcd   : > { %v1846_v4 = vpack.c.bf16 %v1838_v55, %v1838_v55 }
 0xdce   : > { %v1926_v8 = vunpack.c.l.b16 %v1847_v60 }
 0xdcf   : > { %v2750_v59 = vpop.eup %2749  ;;  %v1925_v10 = vunpack.c.l.b16 %v1846_v4 }
 0xdd0   : > { %v1835_v1 = vmul.f32 %v2750_v59, %v2734_v35  ;;  %v1904_v3 = vpop.permute.xlu2 %1903  ;;  %v1879_v6 = vpop.permute.xlu1 %1878 }
 0xdd1   : > { %1916 = vmatpush.bf16.msrb.mxu0 %v1904_v3  ;;  %1891 = vmatpush.bf16.msra.mxu3 %v1879_v6  ;;  %v1927_v19 = vpack.c.b16 %v1926_v8, %v1925_v10 }
 0xdd2   : > { %v1843_v7 = vpack.c.bf16 %v1835_v1, %v1835_v1 }
 0xdd4   : > { %v1876_v38 = vunpack.c.l.b16 %v1843_v7  ;;  %2465 = vmatmul.msk.bf16.vlgmr.msrb.gmra.mxu0 %vm793_vm5, %v1902_v2 }
 0xdd5   : > { %v1929_v14 = vpop.permute.xlu0 %1928 }
 0xdd6   : > { %v1877_v17 = vpack.c.b16 %v1876_v38, %v1875_v9  ;;  %1941 = vmatpush.bf16.msrb.mxu1 %v1929_v14 }
 0xdd8   : > { %2464 = vmatmul.msk.bf16.vlgmr.msra.gmra.mxu3 %vm793_vm5, %v1877_v17 }
 0xdd9   : > { %2466 = vmatmul.msk.bf16.vlgmr.msrb.gmra.mxu1 %vm793_vm5, %v1927_v19 }
 0xddd   : > { %v1854_v13 = vpop.permute.xlu0 %1853 }
 0xdde   : > { %1866 = vmatpush.bf16.msra.mxu2 %v1854_v13 }
 0xde2   : > { %2010 = vmatpush.bf16.msrb.mxu2 %v2553_v11  ;;  %v2664_v11 = vld [vmem:[%s3479_s13 + $0x1] ss:$0 sm:$0xff] }
 0xde6   : > { %2011 = vmatpush.bf16.msrb.mxu2 %v2552_v21 }
 0xdfb   : > { %v1805_v58 = vpop.xlane.xlu1 %1804 }
 0xdfc   : > { %2751 = vrcp.f32 %v1805_v58  ;;  %v2554_v58 = vld [vmem:[%s3480_s14 + $0x10] sm:$0xff] }
 0xe02   : > { %v2752_v22 = vpop.eup %2751 }
 0xe03   : > { %v1833_v23 = vmul.f32 %v2752_v22, %v3341_v41 }
 0xe05   : > { %v1841_v26 = vpack.c.bf16 %v1833_v23, %v1833_v23 }
 0xe07   : > { %v1851_v29 = vunpack.c.l.b16 %v1841_v26 }
 0xe09   : > { %v1802_v18 = vpop.xlane.xlu2 %1801 }
 0xe0a   : > { %2753 = vrcp.f32 %v1802_v18 }
 0xe10   : > { %v2754_v0 = vpop.eup %2753 }
 0xe11   : > { %v1832_v27 = vmul.f32 %v2754_v0, %v2738_v30 }
 0xe13   : > { %v1840_v28 = vpack.c.bf16 %v1832_v27, %v1832_v27 }
 0xe15   : > { %v1850_v31 = vunpack.c.l.b16 %v1840_v28 }
 0xe17   : > { %v1852_v32 = vpack.c.b16 %v1851_v29, %v1850_v31 }
 0xe19   : > { %2463 = vmatmul.msk.bf16.vlgmr.msra.gmra.mxu2 %vm793_vm5, %v1852_v32 }
 0xe51   : > { %v1918_v34 = vpop.f32.mrf.mxu0 }
 0xe56   : > { %v1943_v40 = vpop.f32.mrf.mxu1 }
 0xe59   : > { %v1920_v35 = vpop.f32.mrf.mxu0 }
 0xe5a   : > { %v2635_v36 = vpack.i.bf16 %v1920_v35, %v1918_v34 }
 0xe5b   : > { %v1893_v37 = vpop.f32.mrf.mxu3 }
 0xe5c   : > { %2636 = vrot.lane.b32.xlu0 %v2635_v36, %s3531_s2  ;;  %s2783_s2 = scalar_lea.hbm %s2782_s0, 1 }
 0xe5d   : > { %p2784_p11 = scmp.ne.s32.totalorder %s2782_s0, %s2783_s2  ;;  %p2789_p1 = scmp.lt.s32.totalorder %s2787_s4, %s2783_s2 }
 0xe5e   : > { %v1945_v25 = vpop.f32.mrf.mxu1 }
 0xe5f   : > { %v2645_v41 = vpack.i.bf16 %v1945_v25, %v1943_v40  ;;  %p2785_p12 = pnand %p2784_p11, %p2995_p5  ;;  %p2790_p2 = por %p2789_p1, %p2788_p0 }
 0xe61   : > { %p2786_p13 = pneg %p2785_p12 }
 0xe63   : > { %v1895_v20 = vpop.f32.mrf.mxu3  ;;  %p2791_p3 = pnand %p2790_p2, %p2786_p13 }
 0xe64   : > { %v2640_v39 = vpack.i.bf16 %v1895_v20, %v1893_v37  ;;  %v2663_v20 = vld [vmem:[%s3478_s12 + $0x1] ss:$0 sm:$0xff] }
 0xe66   : > { %2641 = vrot.lane.b32.xlu0 %v2640_v39, %s3532_s24 }
 0xe6e   : > { %2646 = vrot.lane.b32.xlu0 %v2645_v41, %s3533_s25 }
 0xe9c   : > { %v1868_v57 = vpop.f32.mrf.mxu2 }
 0xea4   : > { %v1870_v43 = vpop.f32.mrf.mxu2 }
 0xece   : > { %v2637_v30 = vpop.permute.xlu0 %2636 }
 0xecf   : > { %v2639_v45 = vunpack.i.h.bf16 %v2637_v30  ;;  %v2638_v46 = vunpack.i.l.bf16 %v2637_v30 }
 0xed8   : > { %v2642_v24 = vpop.permute.xlu0 %2641 }
 0xed9   : > { %v2644_v42 = vunpack.i.h.bf16 %v2642_v24  ;;  %v2643_v5 = vunpack.i.l.bf16 %v2642_v24 }
 0xedb   : > { %v1972_v16 = vsel %vm1008_vm7, %v1868_v57, %v2643_v5  ;;  %v1973_v44 = vsel %vm1008_vm7, %v1870_v43, %v2644_v42  ;;  %v2559_v43 = vld [vmem:[%s3482_s16 + $0x38] sm:$0xff] }
 0xedc   : > { %v1974_v49 = vsel %vm793_vm5, %v1972_v16, %v2638_v46  ;;  %v1975_v50 = vsel %vm793_vm5, %v1973_v44, %v2639_v45  ;;  %2182 = vmatpush.bf16.msra.mxu0 %v2559_v43  ;;  %v2558_v16 = vld [vmem:[%s3482_s16 + $0x30] sm:$0xff]  ;;  %v2557_v44 = vld [vmem:[%s3482_s16 + $0x28] sm:$0xff]  ;;  %v2665_v45 = vld [vmem:[%s3481_s15 + $0x1] ss:$0 sm:$0xff] }
 0xee0   : > { %v2647_v15 = vpop.permute.xlu0 %2646  ;;  %2183 = vmatpush.bf16.msra.mxu0 %v2558_v16 }
 0xee1   : > { %v2649_v47 = vunpack.i.h.bf16 %v2647_v15  ;;  %v2648_v48 = vunpack.i.l.bf16 %v2647_v15  ;;  %v2556_v15 = vld [vmem:[%s3482_s16 + $0x20] sm:$0xff] }
 0xee3   : > { %v1976_v51 = vsel %vm1328_vm8, %v1974_v49, %v2648_v48  ;;  %v1977_v52 = vsel %vm1328_vm8, %v1975_v50, %v2649_v47 }
 0xee4   : > { %v1978_v53 = vpack.c.bf16 %v1977_v52, %v1976_v51  ;;  %2184 = vmatpush.bf16.msra.mxu0 %v2557_v44 }
 0xee6   : > { %2480 = vmatmul.msk.bf16.vlgmr.msrb.gmra.mxu2 %vm883_vm14, %v1978_v53 }
 0xee8   : > { %2185 = vmatpush.bf16.msra.mxu0 %v2556_v15 }
 0xf69   : > { %v2013_v55 = vpop.f32.mrf.mxu2 }
 0xf6a   : > { %v2014_v56 = vadd.f32 %v2662_v54, %v2013_v55 }
 0xf6c   : > { %v2018_v59 = vadd.f32 %v2014_v56, %v3257_v62 }
 0xf6e   : > { %v2024_v60 = vsel %vm883_vm14, %v2018_v59, 0.0 }
 0xf6f   : > { %2025 = vadd.xlane.f32.xlu0 %v2024_v60 }
 0xf71   : > { %v2015_v33 = vpop.f32.mrf.mxu2 }
 0xf72   : > { %v2016_v61 = vadd.f32 %v2662_v54, %v2015_v33 }
 0xf74   : > { %v2019_v1 = vadd.f32 %v2016_v61, %v3259_v63  ;;  %v2555_v63 = vld [vmem:[%s3480_s14 + $0x18] sm:$0xff] }
 0xf75   : > { %2110 = vmatpush.bf16.msrb.mxu3 %v2555_v63 }
 0xf76   : > { %v2027_v3 = vsel %vm883_vm14, %v2019_v1, 0.0 }
 0xf77   : > { %2028 = vadd.xlane.f32.xlu2 %v2027_v3 }
 0xf79   : > { %2111 = vmatpush.bf16.msrb.mxu3 %v2554_v58 }
 0xfe2   : > { %v2026_v4 = vpop.xlane.xlu0 %2025 }
 0xfe3   : > { %v2030_v6 = vmul.f32 %v2026_v4, %v3054_v12 }
 0xfe5   : > { %v2032_v2 = vsub.f32 %v2018_v59, %v2030_v6 }
 0xfe7   : > { %v2034_v7 = vmul.f32 %v2032_v2, %v2032_v2 }
 0xfe9   : > { %v2036_v8 = vsel %vm883_vm14, %v2034_v7, 0.0 }
 0xfea   : > { %v2029_v9 = vpop.xlane.xlu2 %2028  ;;  %2037 = vadd.xlane.f32.xlu1 %v2036_v8 }
 0xfeb   : > { %v2031_v62 = vmul.f32 %v2029_v9, %v3054_v12 }
 0xfed   : > { %v2033_v38 = vsub.f32 %v2019_v1, %v2031_v62  ;;  %v2666_v62 = vld [vmem:[%s3483_s17 + $0x1] ss:$0 sm:$0xff] }
 0xfef   : > { %v2035_v10 = vmul.f32 %v2033_v38, %v2033_v38 }
 0xff1   : > { %v2039_v14 = vsel %vm883_vm14, %v2035_v10, 0.0 }
 0xff2   : > { %2040 = vadd.xlane.f32.xlu2 %v2039_v14 }
0x105d   : > { %v2038_v17 = vpop.xlane.xlu1 %2037 }
0x105e   : > { %v2042_v19 = vmul.f32 %v2038_v17, %v3054_v12 }
0x1060   : > { %v2044_v13 = vadd.f32 1e-05, %v2042_v19 }
0x1062   : > { %2755 = vrsqrt.f32 %v2044_v13  ;;  %vm2052_vm7 = vweird.f32 %v2044_v13 }
0x1065   : > { %v2041_v18 = vpop.xlane.xlu2 %2040 }
0x1066   : > { %v2043_v22 = vmul.f32 %v2041_v18, %v3054_v12 }
0x1068   : > { %v2756_v23 = vpop.eup %2755  ;;  %v2045_v0 = vadd.f32 1e-05, %v2043_v22 }
0x1069   : > { %v2047_v26 = vmul.f32 %v2756_v23, %v2044_v13  ;;  %vm2053_vm5 = vweird.f32 %v2756_v23 }
0x106a   : > { %2757 = vrsqrt.f32 %v2045_v0  ;;  %vm2054_vm8 = vmor %vm2052_vm7, %vm2053_vm5  ;;  %vm2062_vm11 = vweird.f32 %v2045_v0 }
0x106b   : > { %v2048_v27 = vmul.f32 %v2756_v23, %v2047_v26 }
0x106d   : > { %v2049_v28 = vmul.f32 0.5, %v2048_v27 }
0x106f   : > { %v2050_v29 = vsub.f32 1.5, %v2049_v28 }
0x1070   : > { %v2758_v31 = vpop.eup %2757 }
0x1071   : > { %v2051_v32 = vmul.f32 %v2756_v23, %v2050_v29  ;;  %v2057_v34 = vmul.f32 %v2758_v31, %v2045_v0  ;;  %vm2063_vm10 = vweird.f32 %v2758_v31  ;;  %v2560_v0 = vld [vmem:[%s3486_s20] sm:$0xff] }
0x1072   : > { %vm2064_vm12 = vmor %vm2062_vm11, %vm2063_vm10 }
0x1073   : > { %v2058_v35 = vmul.f32 %v2758_v31, %v2057_v34  ;;  %v2055_v36 = vsel %vm2054_vm8, %v2756_v23, %v2051_v32  ;;  %v2561_v23 = vld [vmem:[%s3486_s20 + $0x8] sm:$0xff] }
0x1074   : > { %v2066_v39 = vmul.f32 %v2055_v36, %v2032_v2  ;;  %2253 = vmatpush.bf16.msra.mxu1 %v2561_v23 }
0x1075   : > { %v2059_v37 = vmul.f32 0.5, %v2058_v35 }
0x1076   : > { %v2071_v21 = vmul.f32 %v2663_v20, %v2066_v39 }
0x1077   : > { %v2060_v40 = vsub.f32 1.5, %v2059_v37  ;;  %v2667_v37 = vld [vmem:[%s3484_s18 + $0x1] ss:$0 sm:$0xff] }
0x1078   : > { %v2076_v24 = vadd.f32 %v2664_v11, %v2071_v21  ;;  %2254 = vmatpush.bf16.msra.mxu1 %v2560_v0 }
0x1079   : > { %v2061_v25 = vmul.f32 %v2758_v31, %v2060_v40 }
0x107b   : > { %v2065_v41 = vsel %vm2064_vm12, %v2758_v31, %v2061_v25 }
0x107c   : > { %v2067_v30 = vmul.f32 %v2065_v41, %v2033_v38 }
0x107e   : > { %v2072_v57 = vmul.f32 %v2663_v20, %v2067_v30 }
0x1080   : > { %v2077_v42 = vadd.f32 %v2664_v11, %v2072_v57  ;;  %v2231_v11 = vld [vmem:[%s3487_s21] sm:$0x1] }
0x1082   : > { %v2078_v5 = vpack.c.bf16 %v2077_v42, %v2076_v24 }
0x1084   : > { %2496 = vmatmul.msk.bf16.vlgmr.msrb.gmra.mxu3 %vm883_vm14, %v2078_v5 }
0x1107   : > { %v2113_v46 = vpop.f32.mrf.mxu3 }
0x1108   : > { %v2114_v47 = vadd.f32 %v2665_v45, %v2113_v46 }
0x110a   : > { %v2118_v48 = vmul.f32 %v2114_v47, %v2114_v47 }
0x110c   : > { %v2120_v49 = vmul.f32 %v2118_v48, %v2114_v47 }
0x110e   : > { %v2122_v50 = vmul.f32 0.044715, %v2120_v49 }
0x110f   : > { %v2115_v51 = vpop.f32.mrf.mxu3 }
0x1110   : > { %v2124_v52 = vadd.f32 %v2122_v50, %v2114_v47  ;;  %v2116_v53 = vadd.f32 %v2665_v45, %v2115_v51 }
0x1112   : > { %v2126_v54 = vmul.f32 0.7978846, %v2124_v52  ;;  %v2119_v55 = vmul.f32 %v2116_v53, %v2116_v53 }
0x1114   : > { %v2121_v56 = vmul.f32 %v2119_v55, %v2116_v53  ;;  %2759 = vtanh.f32 %v2126_v54 }
0x1116   : > { %v2123_v59 = vmul.f32 0.044715, %v2121_v56 }
0x1118   : > { %v2125_v60 = vadd.f32 %v2123_v59, %v2116_v53 }
0x111a   : > { %v2127_v33 = vmul.f32 0.7978846, %v2125_v60  ;;  %v2760_v61 = vpop.eup %2759 }
0x111b   : > { %v2130_v1 = vadd.f32 1.0, %v2760_v61 }
0x111c   : > { %2761 = vtanh.f32 %v2127_v33 }
0x111d   : > { %v2132_v4 = vmul.f32 0.5, %v2130_v1 }
0x111f   : > { %v2134_v7 = vmul.f32 %v2132_v4, %v2114_v47 }
0x1122   : > { %v2762_v3 = vpop.eup %2761 }
0x1123   : > { %v2131_v6 = vadd.f32 1.0, %v2762_v3 }
0x1125   : > { %v2133_v2 = vmul.f32 0.5, %v2131_v6 }
0x1127   : > { %v2135_v8 = vmul.f32 %v2133_v2, %v2116_v53 }
0x1129   : > { %v2136_v9 = vpack.c.bf16 %v2135_v8, %v2134_v7 }
0x112b   : > { %2522 = vmatmul.msk.bf16.vlgmr.msra.gmra.mxu0 %vm1520_vm0, %v2136_v9 }
0x11a8   : > { %v2187_v38 = vpop.f32.mrf.mxu0 }
0x11a9   : > { %v2188_v10 = vadd.f32 %v2666_v62, %v2187_v38 }
0x11ab   : > { %v2191_v14 = vadd.f32 %v2188_v10, %v2076_v24 }
0x11ad   : > { %v2196_v63 = vsel %vm883_vm14, %v2191_v14, 0.0 }
0x11ae   : > { %2197 = vadd.xlane.f32.xlu1 %v2196_v63 }
0x11b0   : > { %v2189_v17 = vpop.f32.mrf.mxu0 }
0x1221   : > { %v2198_v19 = vpop.xlane.xlu1 %2197 }
0x1222   : > { %v2199_v13 = vmul.f32 %v2198_v19, %v3054_v12 }
0x1224   : > { %v2200_v58 = vsub.f32 %v2191_v14, %v2199_v13 }
0x1226   : > { %v2201_v18 = vmul.f32 %v2200_v58, %v2200_v58 }
0x1228   : > { %v2202_v22 = vsel %vm883_vm14, %v2201_v18, 0.0 }
0x1229   : > { %2203 = vadd.xlane.f32.xlu2 %v2202_v22 }
0x129c   : > { %v2204_v26 = vpop.xlane.xlu2 %2203 }
0x129d   : > { %v2205_v27 = vmul.f32 %v2204_v26, %v3054_v12  ;;  %v2668_v12 = vld [vmem:[%s3485_s19 + $0x1] ss:$0 sm:$0xff] }
0x129f   : > { %v2206_v28 = vadd.f32 1e-05, %v2205_v27 }
0x12a1   : > { %2763 = vrsqrt.f32 %v2206_v28  ;;  %vm2213_vm15 = vweird.f32 %v2206_v28 }
0x12a7   : > { %v2764_v29 = vpop.eup %2763 }
0x12a8   : > { %v2208_v31 = vmul.f32 %v2764_v29, %v2206_v28  ;;  %vm2214_vm13 = vweird.f32 %v2764_v29 }
0x12a9   : > { %vm2215_vm0 = vmor %vm2213_vm15, %vm2214_vm13 }
0x12aa   : > { %v2209_v32 = vmul.f32 %v2764_v29, %v2208_v31 }
0x12ac   : > { %v2210_v34 = vmul.f32 0.5, %v2209_v32 }
0x12ae   : > { %v2211_v35 = vsub.f32 1.5, %v2210_v34 }
0x12b0   : > { %v2212_v36 = vmul.f32 %v2764_v29, %v2211_v35 }
0x12b2   : > { %v2216_v40 = vsel %vm2215_vm0, %v2764_v29, %v2212_v36 }
0x12b3   : > { %v2217_v20 = vmul.f32 %v2216_v40, %v2200_v58 }
0x12b5   : > { %v2221_v39 = vmul.f32 %v2667_v37, %v2217_v20 }
0x12b7   : > { %v2225_v25 = vadd.f32 %v2668_v12, %v2221_v39 }
0x12b9   : > { %v2226_v41 = vpack.c.bf16 %v2225_v25, %v2225_v25 }
0x12bb   : > { %2533 = vmatmul.msk.bf16.vlgmr.msra.gmra.mxu1 %vm883_vm14, %v2226_v41 }
0x1338   : > { %v2256_v21 = vpop.f32.mrf.mxu1 }
0x1339   : > { %v2257_v30 = vadd.f32 %v2256_v21, %v2231_v11 }
0x133b   : > { %2765 = vtanh.f32 %v2257_v30 }
0x1340   : > { %v2258_v57 = vpop.f32.mrf.mxu1 }
0x1341   : > { %v2766_v24 = vpop.eup %2765 }
0x1342   : > { %2261 = vst [vmem:[%s731_s3] sm:$0x1] %v2766_v24 }
0x1343   : > { %2794 = shalt.err (!%p2791_p3)
}
0x1344   : > { %2562 = dma.vmem_to_hbm [thread:$0]  (%p2995_p5), %s2274_s29, 16, %s2276_s30, %s2263_s23  }
0x1345 PF: > { %s3534_s5 = sld [smem:[#allocation7_spill]] }
0x1346   : > { %s3535_s1 = sld [smem:[#allocation5_spill]] }
0x134b   : > { %p2568_p4 = scmp.ge.s32.totalorder %s3534_s5, 2 }
0x134c   : > { %s2287_s7 = sand.u32 1, %s3535_s1  }
0x134d   : > { %p2565_p7 = pnand %p2568_p4, %p2999_p6  ;;  %s2288_s24 = scalar_lea.sflag [#allocation3], %s2287_s7 }
0x134f   : > { %p2566_p8 = pneg %p2565_p7 }
0x1351   : > { %2812 = dma.done.wait (%p2566_p8), %s2288_s24, 16  }
0x1352   : > { %2814 = vsyncadd (%p2566_p8), %s2288_s24, 4294967280  ;;  %s3537_s30 = sld [smem:[#allocation8_spill]]  ;;  %s3540_s3 = smov %s2821_s28 }
0x1353   : > { %s3538_s0 = sld [smem:[#allocation6_spill]] }
0x1354   : > { %s3539_s29 = sld [smem:[#allocation9_spill]] }
0x1358   : > { %p32_p9 = scmp.ge.s32.totalorder %s3537_s30, 4  }
0x1359   : > { %s3541_s28 = smov %s3538_s0 }
0x135a   :  { %34 = sbr.rel (!%p32_p9) target bundleno = 12 (0xc), region = 167 }
0x135f   :  { %2293 = vsyncpa [#allocation3], 1 }
0x1360   :  { %2295 = vsyncpa [#allocation3 + $0x1], 1 }

</bundles_post_ra>
